<compile_context>
chip_gen: v7x
topology: tpu7x:2x2x1
jax: 0.10.0
libtpu: 0.0.40
codegen_flags: <defaults>
</compile_context>

<pallas_src>
import jax
import jax.numpy as jnp
from jax.experimental import pallas as pl
from jax.experimental.pallas import tpu as pltpu


def net_kernel(x_ref, w0t_ref, w1t_ref, out_ls_ref, out_fc0_ref):
    # fc0: (tb, 784) @ (784, 784) -> (tb, 784), f32 accumulation, then ReLU.
    x = x_ref[...]
    x_bf16 = x if x.dtype == jnp.bfloat16 else x.astype(jnp.bfloat16)
    h = jnp.dot(x_bf16, w0t_ref[...], preferred_element_type=jnp.float32)
    h = jnp.maximum(h, 0.0)

    # Single cast reused for the out_fc0 store and the fc1 matmul.
    h_bf16 = h.astype(jnp.bfloat16)
    if out_fc0_ref.dtype == jnp.bfloat16:
        out_fc0_ref[...] = h_bf16
    else:
        out_fc0_ref[...] = h.astype(out_fc0_ref.dtype)

    # fc1: (tb, 784) @ (784, 10) -> (tb, 10), f32 accumulation.
    logits = jnp.dot(h_bf16, w1t_ref[...], preferred_element_type=jnp.float32)

    # log_softmax over dim=1 (numerically stable), computed in f32.
    m = jnp.max(logits, axis=-1, keepdims=True)
    shifted = logits - m
    lse = jnp.log(jnp.sum(jnp.exp(shifted), axis=-1, keepdims=True))
    out_ls_ref[...] = (shifted - lse).astype(out_ls_ref.dtype)


def prepare_params(w0, w1):
    """One-time (init-time) parameter prep: (out, in) f32 -> (in, out) bf16."""
    w0t = jnp.asarray(w0).T.astype(jnp.bfloat16)   # (784, 784)
    w1t = jnp.asarray(w1).T.astype(jnp.bfloat16)   # (784, 10)
    return w0t, w1t


def _round_up(n, m):
    return ((n + m - 1) // m) * m


def net_forward(x, w0t_bf16, w1t_bf16, *, batch_tile=512,
                out_fc0_dtype=jnp.bfloat16):
    """x: (B, ...) flattened to (B, 784). Weights already (in, out) bf16.

    x may be f32 (cast to bf16 in-kernel) or already bf16 (cast fused upstream,
    halving the input HBM stream).
    """
    B = x.shape[0]
    x2d = x.reshape(B, -1)                          # torch.flatten(x, 1)
    in_dim = x2d.shape[1]                           # 784
    hid_dim = w0t_bf16.shape[1]                     # 784
    out_dim = w1t_bf16.shape[1]                     # 10

    # Batch-tile selection:
    #  * >= 2 grid steps whenever B > 8 so "parallel" can shard the batch axis
    #    across both TensorCores on v7x,
    #  * capped at `batch_tile` (default 512) so large batches get long DMAs
    #    (~85% of HBM roofline) while staying inside every generation's
    #    default scoped-VMEM budget,
    #  * multiple of 8 so the MXU M-dim / sublane tiling stays full.
    if B <= 8:
        tb = B                                       # full-array block
    else:
        tb = min(batch_tile, _round_up(pl.cdiv(B, 2), 8))
    grid = (pl.cdiv(B, tb),)

    out_shapes = (
        jax.ShapeDtypeStruct((B, out_dim), jnp.float32),    # log_softmax output
        jax.ShapeDtypeStruct((B, hid_dim), out_fc0_dtype),  # out_fc0 (bf16 by default)
    )

    x_bytes = x2d.size * x2d.dtype.itemsize
    out_fc0_bytes = B * hid_dim * jnp.dtype(out_fc0_dtype).itemsize
    cost = pl.CostEstimate(
        flops=2 * B * in_dim * hid_dim + 2 * B * hid_dim * out_dim,
        transcendentals=B * (out_dim + 1),                  # exp per logit + log
        bytes_accessed=(x_bytes
                        + w0t_bf16.size * 2 + w1t_bf16.size * 2
                        + out_fc0_bytes + B * out_dim * 4),
    )

    cp_kwargs = dict(
        # Batch tiles are independent -> shard across the 2 TCs on v7x.
        dimension_semantics=("parallel",),
    )
    if tb > 512:
        # Only needed for oversized tiles: v5e's default scoped VMEM is 16 MiB.
        # 32 MiB is safe on all generations (v7x scoped default is also 32 MiB).
        cp_kwargs["vmem_limit_bytes"] = 32 * 1024 * 1024

    return pl.pallas_call(
        net_kernel,
        out_shape=out_shapes,
        grid_spec=pltpu.PrefetchScalarGridSpec(
            num_scalar_prefetch=0,
            grid=grid,
            in_specs=[
                # Activations tile over the batch axis (double-buffered DMA).
                pl.BlockSpec((tb, in_dim), lambda i: (i, 0)),
                # Weights: constant block index -> fetched once and resident;
                # single-buffered (no benefit from a second buffer).
                pl.BlockSpec((in_dim, hid_dim), lambda i: (0, 0),
                             pipeline_mode=pl.Buffered(1)),
                pl.BlockSpec((hid_dim, out_dim), lambda i: (0, 0),
                             pipeline_mode=pl.Buffered(1)),
            ],
            out_specs=[
                pl.BlockSpec((tb, out_dim), lambda i: (i, 0)),
                pl.BlockSpec((tb, hid_dim), lambda i: (i, 0)),
            ],
        ),
        compiler_params=pltpu.CompilerParams(**cp_kwargs),
        cost_estimate=cost,
    )(x2d, w0t_bf16, w1t_bf16)


if __name__ == "__main__":
    key = jax.random.PRNGKey(0)
    k_x, k_w0, k_w1 = jax.random.split(key, 3)

    B = 2
    # Input shaped like an MNIST batch (N, C, H, W); forward flattens it.
    x = jax.random.normal(k_x, (B, 1, 28, 28), dtype=jnp.float32)

    # Deterministic parameter init (shapes from nn.Linear: (out, in)).
    w0 = jax.random.normal(k_w0, (28 * 28, 28 * 28), dtype=jnp.float32) * 0.02
    w1 = jax.random.normal(k_w1, (10, 28 * 28), dtype=jnp.float32) * 0.02

    # One-time parameter prep (transpose + bf16 cast), outside the hot path.
    w0t_bf16, w1t_bf16 = prepare_params(w0, w1)

    output, out_fc0 = net_forward(x, w0t_bf16, w1t_bf16)
    jax.block_until_ready((output, out_fc0))

    # --- Sanity checks ---
    x2d = x.reshape(B, -1)
    out_fc0_f32 = out_fc0.astype(jnp.float32)

    # (a) Check vs. a plain-JAX reference with the same bf16-weight numerics /
    #     f32 accumulation (out_fc0 additionally rounded to bf16 in-kernel).
    ref_h = jnp.maximum(
        jnp.dot(x2d.astype(jnp.bfloat16), w0t_bf16,
                preferred_element_type=jnp.float32), 0.0)
    ref_logits = jnp.dot(ref_h.astype(jnp.bfloat16), w1t_bf16,
                         preferred_element_type=jnp.float32)
    ref_ls = jax.nn.log_softmax(ref_logits, axis=1)
    assert jnp.allclose(out_fc0_f32, ref_h, atol=1e-2, rtol=1e-2)
    assert jnp.allclose(output, ref_ls, atol=1e-2, rtol=1e-2)

    # (b) Loose check vs. the original f32 semantics (bf16 weight streaming +
    #     bf16 out_fc0 introduce ~1% relative error, within these bounds).
    f32_h = jnp.maximum(x2d @ w0.T, 0.0)
    f32_ls = jax.nn.log_softmax(f32_h @ w1.T, axis=1)
    assert jnp.allclose(out_fc0_f32, f32_h, atol=5e-2, rtol=5e-2)
    assert jnp.allclose(output, f32_ls, atol=5e-2, rtol=5e-2)

    # (c) Exact-dtype-preserving path still available for strict consumers.
    output_f32, out_fc0_strict = net_forward(
        x, w0t_bf16, w1t_bf16, out_fc0_dtype=jnp.float32)
    jax.block_until_ready((output_f32, out_fc0_strict))
    assert out_fc0_strict.dtype == jnp.float32
    assert jnp.allclose(out_fc0_strict, ref_h, atol=1e-3, rtol=1e-3)

    print("KERNEL_OK")
</pallas_src>

<mosaic_0001>
module attributes {stable_mosaic.version = 11 : i64} {
  func.func @net_kernel(%arg0: i32, %arg1: memref<2x784xf32, #tpu.memory_space<vmem>>, %arg2: memref<784x784xbf16, #tpu.memory_space<vmem>>, %arg3: memref<784x10xbf16, #tpu.memory_space<vmem>>, %arg4: memref<2x10xf32, #tpu.memory_space<vmem>>, %arg5: memref<2x784xbf16, #tpu.memory_space<vmem>>) attributes {dimension_semantics = [#tpu.dimension_semantics<parallel>], iteration_bounds = array<i64: 1>, scalar_prefetch = 0 : i64, scratch_operands = 0 : i64, tpu.core_type = #tpu.core_type<tc>, window_params = [{transform_indices = @transform_0, window_bounds = array<i64: 2, 784>}, {pipeline_mode = #tpu.pipeline_mode<synchronous>, transform_indices = @transform_1, window_bounds = array<i64: 784, 784>}, {pipeline_mode = #tpu.pipeline_mode<synchronous>, transform_indices = @transform_2, window_bounds = array<i64: 784, 10>}, {transform_indices = @transform_3, window_bounds = array<i64: 2, 10>}, {transform_indices = @transform_4, window_bounds = array<i64: 2, 784>}]} {
    %c0 = arith.constant 0 : index
    %c0_0 = arith.constant 0 : index
    %0 = vector.load %arg1[%c0, %c0_0] : memref<2x784xf32, #tpu.memory_space<vmem>>, vector<2x784xf32>
    %1 = arith.truncf %0 : vector<2x784xf32> to vector<2x784xbf16>
    %c0_1 = arith.constant 0 : index
    %c0_2 = arith.constant 0 : index
    %2 = vector.load %arg2[%c0_1, %c0_2] : memref<784x784xbf16, #tpu.memory_space<vmem>>, vector<784x784xbf16>
    %cst = arith.constant dense<0.000000e+00> : vector<2x784xf32>
    %3 = tpu.matmul %1, %2, %cst {dimension_numbers = #tpu.dot_dimension_numbers<[1], [0], [0], [1], [0, 0, 1, 1], [], []>} : vector<2x784xbf16>, vector<784x784xbf16>, vector<2x784xf32> -> vector<2x784xf32>
    %cst_3 = arith.constant 0.000000e+00 : f32
    %4 = vector.broadcast %cst_3 : f32 to vector<2x784xf32>
    %5 = arith.maximumf %3, %4 : vector<2x784xf32>
    %6 = arith.truncf %5 : vector<2x784xf32> to vector<2x784xbf16>
    %c0_4 = arith.constant 0 : index
    %c0_5 = arith.constant 0 : index
    %7 = vector.load %arg5[%c0_4, %c0_5] : memref<2x784xbf16, #tpu.memory_space<vmem>>, vector<2x784xbf16>
    tpu.vector_store %arg5[%c0_4, %c0_5], %6 {strides = array<i32>} : memref<2x784xbf16, #tpu.memory_space<vmem>>, vector<2x784xbf16>,
    %c0_6 = arith.constant 0 : index
    %c0_7 = arith.constant 0 : index
    %8 = vector.load %arg3[%c0_6, %c0_7] : memref<784x10xbf16, #tpu.memory_space<vmem>>, vector<784x10xbf16>
    %cst_8 = arith.constant dense<0.000000e+00> : vector<2x10xf32>
    %9 = tpu.matmul %6, %8, %cst_8 {dimension_numbers = #tpu.dot_dimension_numbers<[1], [0], [0], [1], [0, 0, 1, 1], [], []>} : vector<2x784xbf16>, vector<784x10xbf16>, vector<2x10xf32> -> vector<2x10xf32>
    %cst_9 = arith.constant dense<0xFF800000> : vector<2xf32>
    %10 = vector.multi_reduction <maximumf>, %9, %cst_9 [1] : vector<2x10xf32> to vector<2xf32>
    %11 = vector.shape_cast %10 : vector<2xf32> to vector<2x1xf32>
    %12 = vector.broadcast %11 : vector<2x1xf32> to vector<2x10xf32>
    %13 = arith.subf %9, %12 : vector<2x10xf32>
    %14 = math.exp %13 : vector<2x10xf32>
    %cst_10 = arith.constant dense<0.000000e+00> : vector<2xf32>
    %15 = vector.multi_reduction <add>, %14, %cst_10 [1] : vector<2x10xf32> to vector<2xf32>
    %16 = vector.shape_cast %15 : vector<2xf32> to vector<2x1xf32>
    %17 = math.log %16 : vector<2x1xf32>
    %18 = vector.broadcast %17 : vector<2x1xf32> to vector<2x10xf32>
    %19 = arith.subf %13, %18 : vector<2x10xf32>
    %c0_11 = arith.constant 0 : index
    %c0_12 = arith.constant 0 : index
    %20 = vector.load %arg4[%c0_11, %c0_12] : memref<2x10xf32, #tpu.memory_space<vmem>>, vector<2x10xf32>
    tpu.vector_store %arg4[%c0_11, %c0_12], %19 {strides = array<i32>} : memref<2x10xf32, #tpu.memory_space<vmem>>, vector<2x10xf32>,
    return
  }
  func.func @transform_0(%arg0: i32) -> (i32, i32) {
    %c0_i32 = arith.constant 0 : i32
    %c0_i32_0 = arith.constant 0 : i32
    return %arg0, %c0_i32 : i32, i32
  }
  func.func @transform_1(%arg0: i32) -> (i32, i32) {
    %c0_i32 = arith.constant 0 : i32
    %c0_i32_0 = arith.constant 0 : i32
    %c0_i32_1 = arith.constant 0 : i32
    return %c0_i32, %c0_i32_0 : i32, i32
  }
  func.func @transform_2(%arg0: i32) -> (i32, i32) {
    %c0_i32 = arith.constant 0 : i32
    %c0_i32_0 = arith.constant 0 : i32
    %c0_i32_1 = arith.constant 0 : i32
    return %c0_i32, %c0_i32_0 : i32, i32
  }
  func.func @transform_3(%arg0: i32) -> (i32, i32) {
    %c0_i32 = arith.constant 0 : i32
    %c0_i32_0 = arith.constant 0 : i32
    return %arg0, %c0_i32 : i32, i32
  }
  func.func @transform_4(%arg0: i32) -> (i32, i32) {
    %c0_i32 = arith.constant 0 : i32
    %c0_i32_0 = arith.constant 0 : i32
    return %arg0, %c0_i32 : i32, i32
  }
}

</mosaic_0001>

<bundles_post_ra>
// kernel: tpu_custom_call.1
= control target key start
LH: loop header
LB: loop body
LE: loop exit
PB: predicated region body
PF: predicated region fallthrough
CT: control target
= control target key end

     0   :  { %10 = vsyncpa [#allocation3], 0  ;;  %s5166_s0 = inlined_call_operand.hbm [shape: f32[2,784], index: 0, kind: input, shape index: {}]   ;;  %s5167_s1 = inlined_call_operand.hbm [shape: bf16[784,784], index: 1, kind: input, shape index: {}]   ;;  %s5168_s2 = inlined_call_operand.vmem [shape: bf16[784,10], index: 2, kind: input, shape index: {}]   ;;  %s5169_s3 = inlined_call_operand.hbm [shape: f32[2,10], index: 3, kind: output, shape index: {0}]   ;;  %s5170_s4 = inlined_call_operand.hbm [shape: bf16[2,784], index: 4, kind: output, shape index: {1}]  }
   0x1   :  { %11 = vsyncpa [#allocation6], 0 }
   0x2   :  { %12 = vsyncpa [#allocation4], 0 }
   0x3   :  { %13 = vsyncpa [#allocation9], 0  ;;  %s4825_s15 = smov [#allocation2]   ;;  %s4826_s17 = smov [#allocation5]  }
   0x4   :  { %s20_s16 = sshll.u32 %s4825_s15, 4  ;;  %s29_s18 = sshll.u32 %s4826_s17, 4  ;;  %s21_s16 = int_to_ptr.vmem [resolvable:$true] %s20_s16  ;;  %s4861_s18 = int_to_ptr.vmem [resolvable:$true] %s29_s18 }
   0x5   :  { %s4729_s21 = scalar_lea.hbm %s5166_s0, 224 }
   0x6   :  { %p4730_p0 = scmp.ne.s32.totalorder %s5166_s0, %s4729_s21  ;;  %p4733_p1 = scmp.lt.u32.totalorder %s4729_s21, %s5166_s0 }
   0x8   :  { %p4735_p2 = pnand %p4733_p1, %p4730_p0 }
   0xa   :  { %4738 = shalt.err (!%p4735_p2)
}
   0xb   :  { %s4739_s26 = scalar_lea.vmem %s21_s16, 224  ;;  %p4744_p4 = scmp.lt.s32.totalorder %s21_s16, %s21_s16 }
   0xc   :  { %p4740_p3 = scmp.ne.s32.totalorder %s21_s16, %s4739_s26  ;;  %p4745_p5 = scmp.lt.s32.totalorder %s4739_s26, %s4739_s26 }
   0xe   :  { %p4746_p6 = por %p4745_p5, %p4744_p4 }
  0x10   :  { %p4747_p7 = pnand %p4746_p6, %p4740_p3 }
  0x12   :  { %4750 = shalt.err (!%p4747_p7)
}
  0x13   :  { %23 = dma.hbm_to_vmem [thread:$0]  %s5166_s0, 224, %s21_s16, [#allocation3]  }
  0x14   :  { %s4751_s5 = scalar_lea.hbm %s5167_s1, 43904 }
  0x15   :  { %p4752_p8 = scmp.ne.s32.totalorder %s5167_s1, %s4751_s5  ;;  %p4755_p9 = scmp.lt.u32.totalorder %s4751_s5, %s5167_s1 }
  0x17   :  { %p4757_p10 = pnand %p4755_p9, %p4752_p8 }
  0x19   :  { %4760 = shalt.err (!%p4757_p10)
}
  0x1a   :  { %s4761_s10 = scalar_lea.vmem %s4861_s18, 43904  ;;  %p4766_p12 = scmp.lt.s32.totalorder %s4861_s18, %s4861_s18 }
  0x1b   :  { %p4762_p11 = scmp.ne.s32.totalorder %s4861_s18, %s4761_s10  ;;  %p4767_p13 = scmp.lt.s32.totalorder %s4761_s10, %s4761_s10 }
  0x1d   :  { %p4768_p0 = por %p4767_p13, %p4766_p12 }
  0x1f   :  { %p4769_p1 = pnand %p4768_p0, %p4762_p11 }
  0x21   :  { %4772 = shalt.err (!%p4769_p1)
}
  0x22   :  { %s4827_s0 = smov 448   ;;  %s4828_s11 = smov 28  }
  0x23   :  { %35 = dma.hbm_to_vmem [thread:$0]  %s5167_s1, 43904, %s4861_s18, [#allocation6], %s4827_s0, %s4827_s0, %s4828_s11  }
  0x24   :  { %4817 = dma.done.wait [#allocation3], 224  }
  0x25   :  { %4818 = vsyncadd [#allocation3], 4294967072 }
  0x26   :  { %4819 = dma.done.wait [#allocation6], 43904  }
  0x27   :  { %4820 = vsyncadd [#allocation6], 4294923392  ;;  %v4829_v0 = vmov 0   ;;  %v4830_v1 = vmov 1983009808   ;;  %v53_v3 = vlaneseq  ;;  %vm2252_vm0 = vcmask 130048  }
  0x28   :  { %2411 = vmatprep.mubr.bf16.mxu1 %v4829_v0  ;;  %v51_v2 = vunpack.c.l.s4 %v4830_v1  ;;  %v4184_v4 = vld [vmem:[#allocation5 + $0x4] ss:$28 sps:$4 sm:$0xff]   ;;  %v4190_v10 = vld [vmem:[#allocation5 + $0x3c] ss:$28 sps:$4 sm:$0xff]   ;;  %v4194_v11 = vld [vmem:[#allocation5 + $0xc] ss:$28 sps:$4 sm:$0xff]  }
  0x29   :  { %v4893_v6 = vshrl.u32 %v53_v3, 7  ;;  %v4186_v7 = vld [vmem:[#allocation5 + $0xa84] ss:$28 sps:$4 sm:$0xff]   ;;  %2256 = vmatprep.subr.bf16.mxu0 %v4184_v4  ;;  %v4195_v13 = vld [vmem:[#allocation5 + $0x38] ss:$28 sps:$4 sm:$0xff]   ;;  %vm4832_vm1 = vmmov 0  }
  0x2a   :  { %v52_v5 = vunpack.c.0.s8 %v51_v2  ;;  %v4188_v8 = vld [vmem:[#allocation5] ss:$28 sps:$4 sm:$0xff]   ;;  %2379 = vmatprep.subr.bf16.mxu1 %v4186_v7  ;;  %v4197_v16 = vld [vmem:[#allocation5 + $0x74] ss:$28 sps:$4 sm:$0xff]   ;;  %v4192_v17 = vld [vmem:[#allocation5 + $0x8] ss:$28 sps:$4 sm:$0xff]  }
  0x2b   :  { %v4189_v9 = vld [vmem:[#allocation5 + $0xa80] ss:$28 sps:$4 sm:$0xff]   ;;  %2257 = vmatpush1.bf16.msra.mxu0 %v4188_v8  ;;  %v4202_v19 = vld [vmem:[#allocation5 + $0x70] ss:$28 sps:$4 sm:$0xff]   ;;  %v4208_v23 = vld [vmem:[#allocation5 + $0xa8] ss:$28 sps:$4 sm:$0xff]  }
  0x2c   :  { %2380 = vmatpush1.bf16.msra.mxu1 %v4189_v9  ;;  %v4896_v12 = vsub.s32 %v52_v5, %v4893_v6  ;;  %2258 = vmatprep.subr.bf16.mxu0 %v4190_v10  ;;  %v4898_v14 = vld [vmem:[#allocation2 + $0x8] sm:$0x3f]  ;;  %v4203_v20 = vld [vmem:[#allocation5 + $0xac] ss:$28 sps:$4 sm:$0xff]   ;;  %v4201_v22 = vld [vmem:[#allocation5 + $0x44] ss:$28 sps:$4 sm:$0xff]  }
  0x2d   :  { %2420 = vmatprep.subr.bf16.mxu1 %v4194_v11  ;;  %v66_v15 = vcombine.high %v4898_v14, %v4898_v14  ;;  %v4199_v24 = vld [vmem:[#allocation5 + $0x40] ss:$28 sps:$4 sm:$0xff]   ;;  %v4205_v27 = vld [vmem:[#allocation5 + $0x78] ss:$28 sps:$4 sm:$0xff]   ;;  %v4211_v32 = vld [vmem:[#allocation5 + $0xb0] ss:$28 sps:$4 sm:$0xff]  }
  0x2e   :  { %v4209_v25 = vld [vmem:[#allocation5 + $0xe4] ss:$28 sps:$4 sm:$0xff]   ;;  %v4207_v26 = vld [vmem:[#allocation5 + $0x7c] ss:$28 sps:$4 sm:$0xff]   ;;  %v4213_v30 = vld [vmem:[#allocation5 + $0xb4] ss:$28 sps:$4 sm:$0xff]  }
  0x2f   :  { %2259 = vmatpush1.bf16.msra.mxu0 %v4195_v13  ;;  %v80_v18 = vrot.slane %v66_v15, %v4896_v12  ;;  %v4214_v28 = vld [vmem:[#allocation5 + $0xe0] ss:$28 sps:$4 sm:$0xff]   ;;  %v4220_v31 = vld [vmem:[#allocation5 + $0x118] ss:$28 sps:$4 sm:$0xff]   ;;  %v4219_v34 = vld [vmem:[#allocation5 + $0xec] ss:$28 sps:$4 sm:$0xff]  }
  0x30   :  { %2260 = vmatprep.subr.bf16.mxu0 %v4197_v16  ;;  %v4215_v29 = vld [vmem:[#allocation5 + $0x11c] ss:$28 sps:$4 sm:$0xff]   ;;  %v4221_v33 = vld [vmem:[#allocation5 + $0x154] ss:$28 sps:$4 sm:$0xff]   ;;  %v4217_v35 = vld [vmem:[#allocation5 + $0xe8] ss:$28 sps:$4 sm:$0xff]  }
  0x31   :  { %v4903_v21 = vpack.c.bf16 %v80_v18, %v80_v18  ;;  %v4226_v36 = vld [vmem:[#allocation5 + $0x150] ss:$28 sps:$4 sm:$0xff]   ;;  %v4225_v38 = vld [vmem:[#allocation5 + $0x124] ss:$28 sps:$4 sm:$0xff]   ;;  %v4231_v42 = vld [vmem:[#allocation5 + $0x15c] ss:$28 sps:$4 sm:$0xff]  }
  0x32   :  { %v4227_v37 = vld [vmem:[#allocation5 + $0x18c] ss:$28 sps:$4 sm:$0xff]   ;;  %v4223_v40 = vld [vmem:[#allocation5 + $0x120] ss:$28 sps:$4 sm:$0xff]   ;;  %v4229_v43 = vld [vmem:[#allocation5 + $0x158] ss:$28 sps:$4 sm:$0xff]  }
  0x33   :  { %3934 = vmatmul.mubr.msk.bf16.vlgmr.msra.gmra.mrb[0].mxu1 %vm2252_vm0, %v4903_v21  ;;  %2261 = vmatpush1.bf16.msra.mxu0 %v4202_v19  ;;  %v4232_v39 = vld [vmem:[#allocation5 + $0x188] ss:$28 sps:$4 sm:$0xff]   ;;  %v4238_v44 = vld [vmem:[#allocation5 + $0x1c0] ss:$28 sps:$4 sm:$0xff]   ;;  %v4237_v46 = vld [vmem:[#allocation5 + $0x194] ss:$28 sps:$4 sm:$0xff]  }
  0x34   :  { %2421 = vmatpush1.bf16.msra.mxu1 %v4192_v17  ;;  %2262 = vmatprep.subr.bf16.mxu0 %v4203_v20  ;;  %v4233_v41 = vld [vmem:[#allocation5 + $0x1c4] ss:$28 sps:$4 sm:$0xff]   ;;  %v4239_v45 = vld [vmem:[#allocation5 + $0x1fc] ss:$28 sps:$4 sm:$0xff]   ;;  %v4235_v48 = vld [vmem:[#allocation5 + $0x190] ss:$28 sps:$4 sm:$0xff]  }
  0x35   :  { %2422 = vmatprep.subr.bf16.mxu1 %v4201_v22  ;;  %v4244_v47 = vld [vmem:[#allocation5 + $0x1f8] ss:$28 sps:$4 sm:$0xff]   ;;  %v4243_v50 = vld [vmem:[#allocation5 + $0x1cc] ss:$28 sps:$4 sm:$0xff]   ;;  %v4249_v54 = vld [vmem:[#allocation5 + $0x204] ss:$28 sps:$4 sm:$0xff]  }
  0x36   :  { %v4245_v49 = vld [vmem:[#allocation5 + $0x234] ss:$28 sps:$4 sm:$0xff]   ;;  %v4241_v51 = vld [vmem:[#allocation5 + $0x1c8] ss:$28 sps:$4 sm:$0xff]   ;;  %v4247_v58 = vld [vmem:[#allocation5 + $0x200] ss:$28 sps:$4 sm:$0xff]  }
  0x37   :  { %2263 = vmatpush1.bf16.msra.mxu0 %v4208_v23  ;;  %v4250_v52 = vld [vmem:[#allocation5 + $0x230] ss:$28 sps:$4 sm:$0xff]   ;;  %v4256_v56 = vld [vmem:[#allocation5 + $0x268] ss:$28 sps:$4 sm:$0xff]   ;;  %v4255_v60 = vld [vmem:[#allocation5 + $0x23c] ss:$28 sps:$4 sm:$0xff]  }
  0x38   :  { %2423 = vmatpush1.bf16.msra.mxu1 %v4199_v24  ;;  %2264 = vmatprep.subr.bf16.mxu0 %v4209_v25  ;;  %v4251_v53 = vld [vmem:[#allocation5 + $0x26c] ss:$28 sps:$4 sm:$0xff]   ;;  %v45_v55 = vld [vmem:[#allocation2] sm:$0xff]  ;;  %v4257_v59 = vld [vmem:[#allocation5 + $0x2a4] ss:$28 sps:$4 sm:$0xff]   ;;  %vm2978_vm2 = vcmask 1040384  }
  0x39   :  { %2424 = vmatprep.subr.bf16.mxu1 %v4207_v26  ;;  %v56_v57 = vrot.slane %v45_v55, %v4896_v12  ;;  %v4262_v62 = vld [vmem:[#allocation5 + $0x2a0] ss:$28 sps:$4 sm:$0xff]   ;;  %v4253_v1 = vld [vmem:[#allocation5 + $0x238] ss:$28 sps:$4 sm:$0xff]   ;;  %v49_v5 = vcombine.high %v45_v55, %v45_v55  ;;  %v4259_v7 = vld [vmem:[#allocation5 + $0x270] ss:$28 sps:$4 sm:$0xff]  }
  0x3a   :  { %v4263_v2 = vld [vmem:[#allocation5 + $0x2dc] ss:$28 sps:$4 sm:$0xff]   ;;  %v4261_v3 = vld [vmem:[#allocation5 + $0x274] ss:$28 sps:$4 sm:$0xff]   ;;  %v4267_v9 = vld [vmem:[#allocation5 + $0x2ac] ss:$28 sps:$4 sm:$0xff]  }
  0x3b   :  { %2265 = vmatpush1.bf16.msra.mxu0 %v4214_v28  ;;  %v64_v61 = vcombine.high %v56_v57, %v56_v57  ;;  %v4268_v4 = vld [vmem:[#allocation5 + $0x2d8] ss:$28 sps:$4 sm:$0xff]   ;;  %v4274_v10 = vld [vmem:[#allocation5 + $0x310] ss:$28 sps:$4 sm:$0xff]   ;;  %v4913_v11 = vrot.slane %v49_v5, %v4896_v12  ;;  %v4265_v13 = vld [vmem:[#allocation5 + $0x2a8] ss:$28 sps:$4 sm:$0xff]   ;;  %v4917_v23 = vpack.c.bf16 %v56_v57, %v56_v57  ;;  %v4923_v28 = vrot.slane %v4898_v14, %v4896_v12 }
  0x3c   :  { %2425 = vmatpush1.bf16.msra.mxu1 %v4205_v27  ;;  %2266 = vmatprep.subr.bf16.mxu0 %v4215_v29  ;;  %v4269_v8 = vld [vmem:[#allocation5 + $0x314] ss:$28 sps:$4 sm:$0xff]   ;;  %v4275_v15 = vld [vmem:[#allocation5 + $0x34c] ss:$28 sps:$4 sm:$0xff]   ;;  %v4273_v16 = vld [vmem:[#allocation5 + $0x2e4] ss:$28 sps:$4 sm:$0xff]  }
  0x3d   :  { %2426 = vmatprep.subr.bf16.mxu1 %v4213_v30  ;;  %v4908_v63 = vpack.c.bf16 %v64_v61, %v64_v61  ;;  %v4280_v17 = vld [vmem:[#allocation5 + $0x348] ss:$28 sps:$4 sm:$0xff]   ;;  %v65_v18 = vcombine.high %v4913_v11, %v4913_v11  ;;  %v4271_v19 = vld [vmem:[#allocation5 + $0x2e0] ss:$28 sps:$4 sm:$0xff]   ;;  %v4277_v26 = vld [vmem:[#allocation5 + $0x318] ss:$28 sps:$4 sm:$0xff]  }
  0x3e   :  { %v4283_v20 = vld [vmem:[#allocation5 + $0x384] ss:$28 sps:$4 sm:$0xff]   ;;  %v4279_v22 = vld [vmem:[#allocation5 + $0x31c] ss:$28 sps:$4 sm:$0xff]   ;;  %v4286_v29 = vld [vmem:[#allocation5 + $0x354] ss:$28 sps:$4 sm:$0xff]  }
  0x3f   :  { %2267 = vmatpush1.bf16.msra.mxu0 %v4220_v31  ;;  %2288 = vmatprep.mubr.bf16.mxu0 %v4908_v63  ;;  %v4281_v24 = vld [vmem:[#allocation5 + $0x380] ss:$28 sps:$4 sm:$0xff]   ;;  %v4919_v25 = vpack.c.bf16 %v65_v18, %v65_v18  ;;  %v4287_v30 = vld [vmem:[#allocation5 + $0x3b8] ss:$28 sps:$4 sm:$0xff]   ;;  %v4284_v31 = vld [vmem:[#allocation5 + $0x350] ss:$28 sps:$4 sm:$0xff]  }
  0x40   :  { %2427 = vmatpush1.bf16.msra.mxu1 %v4211_v32  ;;  %2268 = vmatprep.subr.bf16.mxu0 %v4221_v33  ;;  %v4289_v27 = vld [vmem:[#allocation5 + $0x3bc] ss:$28 sps:$4 sm:$0xff]   ;;  %v4295_v32 = vld [vmem:[#allocation5 + $0x3f4] ss:$28 sps:$4 sm:$0xff]   ;;  %v4292_v33 = vld [vmem:[#allocation5 + $0x38c] ss:$28 sps:$4 sm:$0xff]  }
  0x41   :  { %2428 = vmatprep.subr.bf16.mxu1 %v4219_v34  ;;  %2452 = vmatprep.mubr.bf16.mxu1 %v4908_v63  ;;  %v4293_v34 = vld [vmem:[#allocation5 + $0x3f0] ss:$28 sps:$4 sm:$0xff]   ;;  %v4298_v14 = vld [vmem:[#allocation5 + $0x3c4] ss:$28 sps:$4 sm:$0xff]   ;;  %v4328_v55 = vld [vmem:[#allocation5 + $0x4dc] ss:$28 sps:$4 sm:$0xff]  }
  0x42   :  { %v4301_v12 = vld [vmem:[#allocation5 + $0x42c] ss:$28 sps:$4 sm:$0xff]   ;;  %v4326_v57 = vld [vmem:[#allocation5 + $0x4d8] ss:$28 sps:$4 sm:$0xff]   ;;  %v4346_v5 = vld [vmem:[#allocation5 + $0x584] ss:$28 sps:$4 sm:$0xff]  }
  0x43   :  { %2269 = vmatpush1.bf16.msra.mxu0 %v4226_v36  ;;  %v4299_v36 = vld [vmem:[#allocation5 + $0x428] ss:$28 sps:$4 sm:$0xff]   ;;  %v4332_v61 = vld [vmem:[#allocation5 + $0x510] ss:$28 sps:$4 sm:$0xff]   ;;  %v4359_v18 = vld [vmem:[#allocation5 + $0x658] ss:$28 sps:$4 sm:$0xff]  }
  0x44   :  { %2429 = vmatpush1.bf16.msra.mxu1 %v4217_v35  ;;  %2270 = vmatprep.subr.bf16.mxu0 %v4227_v37  ;;  %v4290_v35 = vld [vmem:[#allocation5 + $0x388] ss:$28 sps:$4 sm:$0xff]   ;;  %v4296_v37 = vld [vmem:[#allocation5 + $0x3c0] ss:$28 sps:$4 sm:$0xff]   ;;  %vm2979_vm3 = vcmask 1041409   ;;  %vm2981_vm5 = vcmask 1042434  }
  0x45   :  { %2430 = vmatprep.subr.bf16.mxu1 %v4225_v38  ;;  %v4307_v38 = vld [vmem:[#allocation5 + $0x464] ss:$28 sps:$4 sm:$0xff]   ;;  %vm2980_vm4 = vmor %vm2979_vm3, %vm2978_vm2  ;;  %vm2983_vm7 = vcmask 1043459   ;;  %vm2985_vm9 = vcmask 1044484   ;;  %vm2987_vm11 = vcmask 1045509   ;;  %vm2989_vm13 = vcmask 129030  }
  0x46   :  { %vm2982_vm6 = vmor %vm2981_vm5, %vm2980_vm4  ;;  %vm3547_vm15 = vcmask 74752  }
  0x47   :  { %2271 = vmatpush1.bf16.msra.mxu0 %v4232_v39  ;;  %v4304_v39 = vld [vmem:[#allocation5 + $0x3fc] ss:$28 sps:$4 sm:$0xff]   ;;  %vm2984_vm8 = vmor %vm2983_vm7, %vm2982_vm6 }
  0x48   :  { %2431 = vmatpush1.bf16.msra.mxu1 %v4223_v40  ;;  %2272 = vmatprep.subr.bf16.mxu0 %v4233_v41  ;;  %v4305_v40 = vld [vmem:[#allocation5 + $0x460] ss:$28 sps:$4 sm:$0xff]   ;;  %v4302_v41 = vld [vmem:[#allocation5 + $0x3f8] ss:$28 sps:$4 sm:$0xff]   ;;  %vm2986_vm10 = vmor %vm2985_vm9, %vm2984_vm8 }
  0x49   :  { %2432 = vmatprep.subr.bf16.mxu1 %v4231_v42  ;;  %v4313_v42 = vld [vmem:[#allocation5 + $0x49c] ss:$28 sps:$4 sm:$0xff]   ;;  %vm2988_vm12 = vmor %vm2987_vm11, %vm2986_vm10 }
  0x4a   :  { %vm2990_vm14 = vmor %vm2989_vm13, %vm2988_vm12 }
  0x4b   :  { %2273 = vmatpush1.bf16.msra.mxu0 %v4238_v44  ;;  %v4311_v44 = vld [vmem:[#allocation5 + $0x498] ss:$28 sps:$4 sm:$0xff]  }
  0x4c   :  { %2433 = vmatpush1.bf16.msra.mxu1 %v4229_v43  ;;  %2274 = vmatprep.subr.bf16.mxu0 %v4239_v45  ;;  %v4310_v43 = vld [vmem:[#allocation5 + $0x434] ss:$28 sps:$4 sm:$0xff]  }
  0x4d   :  { %2434 = vmatprep.subr.bf16.mxu1 %v4237_v46  ;;  %v4308_v45 = vld [vmem:[#allocation5 + $0x430] ss:$28 sps:$4 sm:$0xff]  }
  0x4e   :  { %v4319_v46 = vld [vmem:[#allocation5 + $0x4d4] ss:$28 sps:$4 sm:$0xff]  }
  0x4f   :  { %2275 = vmatpush1.bf16.msra.mxu0 %v4244_v47  ;;  %v4316_v47 = vld [vmem:[#allocation5 + $0x46c] ss:$28 sps:$4 sm:$0xff]  }
  0x50   :  { %2435 = vmatpush1.bf16.msra.mxu1 %v4235_v48  ;;  %2276 = vmatprep.subr.bf16.mxu0 %v4245_v49  ;;  %v4317_v48 = vld [vmem:[#allocation5 + $0x4d0] ss:$28 sps:$4 sm:$0xff]   ;;  %v4314_v49 = vld [vmem:[#allocation5 + $0x468] ss:$28 sps:$4 sm:$0xff]  }
  0x51   :  { %2436 = vmatprep.subr.bf16.mxu1 %v4243_v50  ;;  %v4325_v50 = vld [vmem:[#allocation5 + $0x50c] ss:$28 sps:$4 sm:$0xff]  }
  0x53   :  { %2277 = vmatpush1.bf16.msra.mxu0 %v4250_v52  ;;  %v4323_v52 = vld [vmem:[#allocation5 + $0x508] ss:$28 sps:$4 sm:$0xff]  }
  0x54   :  { %2437 = vmatpush1.bf16.msra.mxu1 %v4241_v51  ;;  %2278 = vmatprep.subr.bf16.mxu0 %v4251_v53  ;;  %v4322_v51 = vld [vmem:[#allocation5 + $0x4a4] ss:$28 sps:$4 sm:$0xff]  }
  0x55   :  { %2438 = vmatprep.subr.bf16.mxu1 %v4249_v54  ;;  %v4320_v53 = vld [vmem:[#allocation5 + $0x4a0] ss:$28 sps:$4 sm:$0xff]  }
  0x56   :  { %v4331_v54 = vld [vmem:[#allocation5 + $0x544] ss:$28 sps:$4 sm:$0xff]  }
  0x57   :  { %2279 = vmatpush1.bf16.msra.mxu0 %v4256_v56  ;;  %v4329_v56 = vld [vmem:[#allocation5 + $0x540] ss:$28 sps:$4 sm:$0xff]  }
  0x58   :  { %2439 = vmatpush1.bf16.msra.mxu1 %v4247_v58  ;;  %2280 = vmatprep.subr.bf16.mxu0 %v4257_v59  ;;  %v4337_v58 = vld [vmem:[#allocation5 + $0x57c] ss:$28 sps:$4 sm:$0xff]   ;;  %v4334_v59 = vld [vmem:[#allocation5 + $0x514] ss:$28 sps:$4 sm:$0xff]  }
  0x59   :  { %2440 = vmatprep.subr.bf16.mxu1 %v4255_v60  ;;  %v4335_v60 = vld [vmem:[#allocation5 + $0x578] ss:$28 sps:$4 sm:$0xff]  }
  0x5b   :  { %2281 = vmatpush1.bf16.msra.mxu0 %v4262_v62  ;;  %v4343_v62 = vld [vmem:[#allocation5 + $0x5b4] ss:$28 sps:$4 sm:$0xff]  }
  0x5c   :  { %2441 = vmatpush1.bf16.msra.mxu1 %v4253_v1  ;;  %2282 = vmatprep.subr.bf16.mxu0 %v4263_v2  ;;  %v4340_v1 = vld [vmem:[#allocation5 + $0x54c] ss:$28 sps:$4 sm:$0xff]  }
  0x5d   :  { %2442 = vmatprep.subr.bf16.mxu1 %v4261_v3  ;;  %v4341_v2 = vld [vmem:[#allocation5 + $0x5b0] ss:$28 sps:$4 sm:$0xff]   ;;  %v4338_v3 = vld [vmem:[#allocation5 + $0x548] ss:$28 sps:$4 sm:$0xff]  }
  0x5f   :  { %2283 = vmatpush1.bf16.msra.mxu0 %v4268_v4  ;;  %v4349_v4 = vld [vmem:[#allocation5 + $0x5ec] ss:$28 sps:$4 sm:$0xff]  }
  0x60   :  { %2443 = vmatpush1.bf16.msra.mxu1 %v4259_v7  ;;  %2284 = vmatprep.subr.bf16.mxu0 %v4269_v8  ;;  %v4347_v7 = vld [vmem:[#allocation5 + $0x5e8] ss:$28 sps:$4 sm:$0xff]   ;;  %v4344_v8 = vld [vmem:[#allocation5 + $0x580] ss:$28 sps:$4 sm:$0xff]  }
  0x61   :  { %2444 = vmatprep.subr.bf16.mxu1 %v4267_v9  ;;  %v4355_v9 = vld [vmem:[#allocation5 + $0x624] ss:$28 sps:$4 sm:$0xff]  }
  0x63   :  { %2285 = vmatpush1.bf16.msra.mxu0 %v4274_v10  ;;  %v4352_v10 = vld [vmem:[#allocation5 + $0x5bc] ss:$28 sps:$4 sm:$0xff]  }
  0x64   :  { %2445 = vmatpush1.bf16.msra.mxu1 %v4265_v13  ;;  %2286 = vmatprep.subr.bf16.mxu0 %v4275_v15  ;;  %v4353_v13 = vld [vmem:[#allocation5 + $0x620] ss:$28 sps:$4 sm:$0xff]   ;;  %v4350_v15 = vld [vmem:[#allocation5 + $0x5b8] ss:$28 sps:$4 sm:$0xff]  }
  0x65   :  { %2446 = vmatprep.subr.bf16.mxu1 %v4273_v16  ;;  %v4361_v16 = vld [vmem:[#allocation5 + $0x65c] ss:$28 sps:$4 sm:$0xff]  }
  0x67   :  { %2287 = vmatpush1.bf16.msra.mxu0 %v4280_v17  ;;  %v4358_v17 = vld [vmem:[#allocation5 + $0x5f4] ss:$28 sps:$4 sm:$0xff]  }
  0x68   :  { %2447 = vmatpush1.bf16.msra.mxu1 %v4271_v19  ;;  %2297 = vmatprep.subr.bf16.mxu0 %v4283_v20  ;;  %v4356_v19 = vld [vmem:[#allocation5 + $0x5f0] ss:$28 sps:$4 sm:$0xff]  }
  0x69   :  { %2448 = vmatprep.subr.bf16.mxu1 %v4279_v22  ;;  %v4367_v20 = vld [vmem:[#allocation5 + $0x694] ss:$28 sps:$4 sm:$0xff]   ;;  %v4364_v22 = vld [vmem:[#allocation5 + $0x62c] ss:$28 sps:$4 sm:$0xff]  }
  0x6a   :  { %2289 = vmatmul.mubr.bf16.vlgmr.msra.gmra.mrb[0].mxu0 %v4917_v23 }
  0x6b   :  { %2298 = vmatpush1.bf16.msra.mxu0 %v4281_v24  ;;  %2329 = vmatprep.mubr.bf16.mxu0 %v4919_v25  ;;  %v4365_v24 = vld [vmem:[#allocation5 + $0x690] ss:$28 sps:$4 sm:$0xff]  }
  0x6c   :  { %2449 = vmatpush1.bf16.msra.mxu1 %v4277_v26  ;;  %2299 = vmatprep.subr.bf16.mxu0 %v4289_v27  ;;  %v4362_v26 = vld [vmem:[#allocation5 + $0x628] ss:$28 sps:$4 sm:$0xff]  }
  0x6d   :  { %2450 = vmatprep.subr.bf16.mxu1 %v4286_v29  ;;  %v4373_v27 = vld [vmem:[#allocation5 + $0x6cc] ss:$28 sps:$4 sm:$0xff]   ;;  %v4370_v29 = vld [vmem:[#allocation5 + $0x664] ss:$28 sps:$4 sm:$0xff]  }
  0x6f   :  { %2300 = vmatpush1.bf16.msra.mxu0 %v4287_v30  ;;  %v4371_v30 = vld [vmem:[#allocation5 + $0x6c8] ss:$28 sps:$4 sm:$0xff]  }
  0x70   :  { %2451 = vmatpush1.bf16.msra.mxu1 %v4284_v31  ;;  %2301 = vmatprep.subr.bf16.mxu0 %v4295_v32  ;;  %v81_v31 = vcombine.high %v4923_v28, %v4923_v28  ;;  %v4368_v32 = vld [vmem:[#allocation5 + $0x660] ss:$28 sps:$4 sm:$0xff]  }
  0x71   :  { %2461 = vmatprep.subr.bf16.mxu1 %v4292_v33  ;;  %v4380_v33 = vld [vmem:[#allocation5 + $0x704] ss:$28 sps:$4 sm:$0xff]  }
  0x73   :  { %2453 = vmatmul.mubr.bf16.vlgmr.msra.gmra.mrb[4].mxu1 %v4917_v23  ;;  %2302 = vmatpush1.bf16.msra.mxu0 %v4293_v34  ;;  %v4376_v34 = vld [vmem:[#allocation5 + $0x69c] ss:$28 sps:$4 sm:$0xff]  }
  0x74   :  { %2462 = vmatpush1.bf16.msra.mxu1 %v4290_v35  ;;  %2303 = vmatprep.subr.bf16.mxu0 %v4301_v12  ;;  %v4933_v35 = vpack.c.bf16 %v4913_v11, %v4913_v11  ;;  %v4378_v12 = vld [vmem:[#allocation5 + $0x700] ss:$28 sps:$4 sm:$0xff]   ;;  %v4392_v11 = vld [vmem:[#allocation5 + $0x774] ss:$28 sps:$4 sm:$0xff]  }
  0x75   :  { %2463 = vmatprep.subr.bf16.mxu1 %v4298_v14  ;;  %2493 = vmatprep.mubr.bf16.mxu1 %v4919_v25  ;;  %v4935_v14 = vpack.c.bf16 %v81_v31, %v81_v31  ;;  %v4455_v31 = vld [vmem:[#allocation5 + $0x974] ss:$28 sps:$4 sm:$0xff]  }
  0x77   :  { %2304 = vmatpush1.bf16.msra.mxu0 %v4299_v36  ;;  %v4374_v36 = vld [vmem:[#allocation5 + $0x698] ss:$28 sps:$4 sm:$0xff]  }
  0x78   :  { %2464 = vmatpush1.bf16.msra.mxu1 %v4296_v37  ;;  %2305 = vmatprep.subr.bf16.mxu0 %v4307_v38  ;;  %v4386_v37 = vld [vmem:[#allocation5 + $0x73c] ss:$28 sps:$4 sm:$0xff]   ;;  %v4383_v38 = vld [vmem:[#allocation5 + $0x6d4] ss:$28 sps:$4 sm:$0xff]  }
  0x79   :  { %2465 = vmatprep.subr.bf16.mxu1 %v4304_v39  ;;  %v4384_v39 = vld [vmem:[#allocation5 + $0x738] ss:$28 sps:$4 sm:$0xff]  }
  0x7b   :  { %2306 = vmatpush1.bf16.msra.mxu0 %v4305_v40  ;;  %v4381_v40 = vld [vmem:[#allocation5 + $0x6d0] ss:$28 sps:$4 sm:$0xff]  }
  0x7c   :  { %2466 = vmatpush1.bf16.msra.mxu1 %v4302_v41  ;;  %2307 = vmatprep.subr.bf16.mxu0 %v4313_v42  ;;  %v4389_v41 = vld [vmem:[#allocation5 + $0x70c] ss:$28 sps:$4 sm:$0xff]  }
  0x7d   :  { %2467 = vmatprep.subr.bf16.mxu1 %v4310_v43  ;;  %v4390_v42 = vld [vmem:[#allocation5 + $0x770] ss:$28 sps:$4 sm:$0xff]   ;;  %v4387_v43 = vld [vmem:[#allocation5 + $0x708] ss:$28 sps:$4 sm:$0xff]  }
  0x7f   :  { %2308 = vmatpush1.bf16.msra.mxu0 %v4311_v44  ;;  %v4398_v44 = vld [vmem:[#allocation5 + $0x7ac] ss:$28 sps:$4 sm:$0xff]  }
  0x80   :  { %2468 = vmatpush1.bf16.msra.mxu1 %v4308_v45  ;;  %2309 = vmatprep.subr.bf16.mxu0 %v4319_v46  ;;  %v4395_v45 = vld [vmem:[#allocation5 + $0x744] ss:$28 sps:$4 sm:$0xff]  }
  0x81   :  { %2469 = vmatprep.subr.bf16.mxu1 %v4316_v47  ;;  %v4396_v46 = vld [vmem:[#allocation5 + $0x7a8] ss:$28 sps:$4 sm:$0xff]   ;;  %v4393_v47 = vld [vmem:[#allocation5 + $0x740] ss:$28 sps:$4 sm:$0xff]  }
  0x83   :  { %2310 = vmatpush1.bf16.msra.mxu0 %v4317_v48  ;;  %v4404_v48 = vld [vmem:[#allocation5 + $0x7e4] ss:$28 sps:$4 sm:$0xff]  }
  0x84   :  { %2470 = vmatpush1.bf16.msra.mxu1 %v4314_v49  ;;  %2311 = vmatprep.subr.bf16.mxu0 %v4325_v50  ;;  %v4401_v49 = vld [vmem:[#allocation5 + $0x77c] ss:$28 sps:$4 sm:$0xff]  }
  0x85   :  { %2471 = vmatprep.subr.bf16.mxu1 %v4322_v51  ;;  %v4399_v50 = vld [vmem:[#allocation5 + $0x778] ss:$28 sps:$4 sm:$0xff]   ;;  %v4402_v51 = vld [vmem:[#allocation5 + $0x7e0] ss:$28 sps:$4 sm:$0xff]  }
  0x87   :  { %2312 = vmatpush1.bf16.msra.mxu0 %v4323_v52  ;;  %v4410_v52 = vld [vmem:[#allocation5 + $0x81c] ss:$28 sps:$4 sm:$0xff]  }
  0x88   :  { %2472 = vmatpush1.bf16.msra.mxu1 %v4320_v53  ;;  %2313 = vmatprep.subr.bf16.mxu0 %v4331_v54  ;;  %v4407_v53 = vld [vmem:[#allocation5 + $0x7b4] ss:$28 sps:$4 sm:$0xff]  }
  0x89   :  { %2473 = vmatprep.subr.bf16.mxu1 %v4328_v55  ;;  %v4405_v54 = vld [vmem:[#allocation5 + $0x7b0] ss:$28 sps:$4 sm:$0xff]   ;;  %v4408_v55 = vld [vmem:[#allocation5 + $0x818] ss:$28 sps:$4 sm:$0xff]  }
  0x8b   :  { %2314 = vmatpush1.bf16.msra.mxu0 %v4329_v56  ;;  %v4416_v56 = vld [vmem:[#allocation5 + $0x854] ss:$28 sps:$4 sm:$0xff]  }
  0x8c   :  { %2474 = vmatpush1.bf16.msra.mxu1 %v4326_v57  ;;  %2315 = vmatprep.subr.bf16.mxu0 %v4337_v58  ;;  %v4413_v57 = vld [vmem:[#allocation5 + $0x7ec] ss:$28 sps:$4 sm:$0xff]  }
  0x8d   :  { %2475 = vmatprep.subr.bf16.mxu1 %v4334_v59  ;;  %v4411_v58 = vld [vmem:[#allocation5 + $0x7e8] ss:$28 sps:$4 sm:$0xff]   ;;  %v4414_v59 = vld [vmem:[#allocation5 + $0x850] ss:$28 sps:$4 sm:$0xff]  }
  0x8f   :  { %2316 = vmatpush1.bf16.msra.mxu0 %v4335_v60  ;;  %v4422_v60 = vld [vmem:[#allocation5 + $0x88c] ss:$28 sps:$4 sm:$0xff]  }
  0x90   :  { %2476 = vmatpush1.bf16.msra.mxu1 %v4332_v61  ;;  %2317 = vmatprep.subr.bf16.mxu0 %v4343_v62  ;;  %v4419_v61 = vld [vmem:[#allocation5 + $0x824] ss:$28 sps:$4 sm:$0xff]  }
  0x91   :  { %2477 = vmatprep.subr.bf16.mxu1 %v4340_v1  ;;  %v4420_v62 = vld [vmem:[#allocation5 + $0x888] ss:$28 sps:$4 sm:$0xff]   ;;  %v4417_v1 = vld [vmem:[#allocation5 + $0x820] ss:$28 sps:$4 sm:$0xff]  }
  0x93   :  { %2318 = vmatpush1.bf16.msra.mxu0 %v4341_v2  ;;  %v4428_v2 = vld [vmem:[#allocation5 + $0x8c4] ss:$28 sps:$4 sm:$0xff]  }
  0x94   :  { %2478 = vmatpush1.bf16.msra.mxu1 %v4338_v3  ;;  %2319 = vmatprep.subr.bf16.mxu0 %v4349_v4  ;;  %v4425_v3 = vld [vmem:[#allocation5 + $0x85c] ss:$28 sps:$4 sm:$0xff]  }
  0x95   :  { %2479 = vmatprep.subr.bf16.mxu1 %v4346_v5  ;;  %v4423_v4 = vld [vmem:[#allocation5 + $0x858] ss:$28 sps:$4 sm:$0xff]   ;;  %v4426_v5 = vld [vmem:[#allocation5 + $0x8c0] ss:$28 sps:$4 sm:$0xff]  }
  0x97   :  { %2320 = vmatpush1.bf16.msra.mxu0 %v4347_v7  ;;  %v4434_v7 = vld [vmem:[#allocation5 + $0x8fc] ss:$28 sps:$4 sm:$0xff]  }
  0x98   :  { %2480 = vmatpush1.bf16.msra.mxu1 %v4344_v8  ;;  %2321 = vmatprep.subr.bf16.mxu0 %v4355_v9  ;;  %v4431_v8 = vld [vmem:[#allocation5 + $0x894] ss:$28 sps:$4 sm:$0xff]  }
  0x99   :  { %2481 = vmatprep.subr.bf16.mxu1 %v4352_v10  ;;  %v4429_v9 = vld [vmem:[#allocation5 + $0x890] ss:$28 sps:$4 sm:$0xff]   ;;  %v4432_v10 = vld [vmem:[#allocation5 + $0x8f8] ss:$28 sps:$4 sm:$0xff]  }
  0x9b   :  { %2322 = vmatpush1.bf16.msra.mxu0 %v4353_v13  ;;  %v4440_v13 = vld [vmem:[#allocation5 + $0x934] ss:$28 sps:$4 sm:$0xff]  }
  0x9c   :  { %2482 = vmatpush1.bf16.msra.mxu1 %v4350_v15  ;;  %2323 = vmatprep.subr.bf16.mxu0 %v4361_v16  ;;  %v4437_v15 = vld [vmem:[#allocation5 + $0x8cc] ss:$28 sps:$4 sm:$0xff]  }
  0x9d   :  { %2483 = vmatprep.subr.bf16.mxu1 %v4358_v17  ;;  %v4435_v16 = vld [vmem:[#allocation5 + $0x8c8] ss:$28 sps:$4 sm:$0xff]   ;;  %v4438_v17 = vld [vmem:[#allocation5 + $0x930] ss:$28 sps:$4 sm:$0xff]  }
  0x9f   :  { %2324 = vmatpush1.bf16.msra.mxu0 %v4359_v18  ;;  %v4446_v18 = vld [vmem:[#allocation5 + $0x96c] ss:$28 sps:$4 sm:$0xff]  }
  0xa0   :  { %2484 = vmatpush1.bf16.msra.mxu1 %v4356_v19  ;;  %2325 = vmatprep.subr.bf16.mxu0 %v4367_v20  ;;  %v4443_v19 = vld [vmem:[#allocation5 + $0x904] ss:$28 sps:$4 sm:$0xff]  }
  0xa1   :  { %2485 = vmatprep.subr.bf16.mxu1 %v4364_v22  ;;  %v4441_v20 = vld [vmem:[#allocation5 + $0x900] ss:$28 sps:$4 sm:$0xff]   ;;  %v4444_v22 = vld [vmem:[#allocation5 + $0x968] ss:$28 sps:$4 sm:$0xff]  }
  0xa3   :  { %2326 = vmatpush1.bf16.msra.mxu0 %v4365_v24  ;;  %v4452_v24 = vld [vmem:[#allocation5 + $0x9a4] ss:$28 sps:$4 sm:$0xff]  }
  0xa4   :  { %2486 = vmatpush1.bf16.msra.mxu1 %v4362_v26  ;;  %2327 = vmatprep.subr.bf16.mxu0 %v4373_v27  ;;  %v4449_v26 = vld [vmem:[#allocation5 + $0x93c] ss:$28 sps:$4 sm:$0xff]  }
  0xa5   :  { %2487 = vmatprep.subr.bf16.mxu1 %v4370_v29  ;;  %v4450_v27 = vld [vmem:[#allocation5 + $0x9a0] ss:$28 sps:$4 sm:$0xff]   ;;  %v4447_v29 = vld [vmem:[#allocation5 + $0x938] ss:$28 sps:$4 sm:$0xff]  }
  0xa7   :  { %2328 = vmatpush1.bf16.msra.mxu0 %v4371_v30  ;;  %v4458_v30 = vld [vmem:[#allocation5 + $0x9dc] ss:$28 sps:$4 sm:$0xff]  }
  0xa8   :  { %2488 = vmatpush1.bf16.msra.mxu1 %v4368_v32  ;;  %2338 = vmatprep.subr.bf16.mxu0 %v4380_v33  ;;  %v4453_v32 = vld [vmem:[#allocation5 + $0x970] ss:$28 sps:$4 sm:$0xff]   ;;  %v4456_v33 = vld [vmem:[#allocation5 + $0x9d8] ss:$28 sps:$4 sm:$0xff]  }
  0xa9   :  { %2489 = vmatprep.subr.bf16.mxu1 %v4376_v34  ;;  %v4464_v34 = vld [vmem:[#allocation5 + $0xa14] ss:$28 sps:$4 sm:$0xff]  }
  0xaa   :  { %2330 = vmatmul.mubr.bf16.vlgmr.msra.gmra.mrb[0].mxu0 %v4933_v35 }
  0xab   :  { %2339 = vmatpush1.bf16.msra.mxu0 %v4378_v12  ;;  %2370 = vmatprep.mubr.bf16.mxu0 %v4935_v14  ;;  %v4461_v12 = vld [vmem:[#allocation5 + $0x9ac] ss:$28 sps:$4 sm:$0xff]  }
  0xac   :  { %2490 = vmatpush1.bf16.msra.mxu1 %v4374_v36  ;;  %2340 = vmatprep.subr.bf16.mxu0 %v4386_v37  ;;  %v4459_v36 = vld [vmem:[#allocation5 + $0x9a8] ss:$28 sps:$4 sm:$0xff]   ;;  %v4462_v37 = vld [vmem:[#allocation5 + $0xa10] ss:$28 sps:$4 sm:$0xff]  }
  0xad   :  { %2491 = vmatprep.subr.bf16.mxu1 %v4383_v38  ;;  %v4470_v38 = vld [vmem:[#allocation5 + $0xa4c] ss:$28 sps:$4 sm:$0xff]  }
  0xaf   :  { %2341 = vmatpush1.bf16.msra.mxu0 %v4384_v39  ;;  %v4467_v39 = vld [vmem:[#allocation5 + $0x9e4] ss:$28 sps:$4 sm:$0xff]  }
  0xb0   :  { %2492 = vmatpush1.bf16.msra.mxu1 %v4381_v40  ;;  %2342 = vmatprep.subr.bf16.mxu0 %v4392_v11  ;;  %v4465_v40 = vld [vmem:[#allocation5 + $0x9e0] ss:$28 sps:$4 sm:$0xff]   ;;  %v4468_v11 = vld [vmem:[#allocation5 + $0xa48] ss:$28 sps:$4 sm:$0xff]  }
  0xb1   :  { %2502 = vmatprep.subr.bf16.mxu1 %v4389_v41  ;;  %v4479_v41 = vld [vmem:[#allocation5 + $0x14] ss:$28 sps:$4 sm:$0xff]  }
  0xb3   :  { %2494 = vmatmul.mubr.bf16.vlgmr.msra.gmra.mrb[4].mxu1 %v4933_v35  ;;  %2343 = vmatpush1.bf16.msra.mxu0 %v4390_v42  ;;  %v4473_v42 = vld [vmem:[#allocation5 + $0xa1c] ss:$28 sps:$4 sm:$0xff]  }
  0xb4   :  { %2503 = vmatpush1.bf16.msra.mxu1 %v4387_v43  ;;  %2344 = vmatprep.subr.bf16.mxu0 %v4398_v44  ;;  %v4471_v43 = vld [vmem:[#allocation5 + $0xa18] ss:$28 sps:$4 sm:$0xff]   ;;  %v4943_v44 = vpack.c.bf16 %v4923_v28, %v4923_v28  ;;  %v4488_v28 = vld [vmem:[#allocation5 + $0xa8c] ss:$28 sps:$4 sm:$0xff]  }
  0xb5   :  { %2504 = vmatprep.subr.bf16.mxu1 %v4395_v45  ;;  %2534 = vmatprep.mubr.bf16.mxu1 %v4935_v14  ;;  %v4477_v45 = vld [vmem:[#allocation5 + $0x10] ss:$28 sps:$4 sm:$0xff]  }
  0xb7   :  { %2345 = vmatpush1.bf16.msra.mxu0 %v4396_v46  ;;  %v4482_v46 = vld [vmem:[#allocation5 + $0x4c] ss:$28 sps:$4 sm:$0xff]  }
  0xb8   :  { %2505 = vmatpush1.bf16.msra.mxu1 %v4393_v47  ;;  %2346 = vmatprep.subr.bf16.mxu0 %v4404_v48  ;;  %v4476_v47 = vld [vmem:[#allocation5 + $0xa54] ss:$28 sps:$4 sm:$0xff]   ;;  %v4480_v48 = vld [vmem:[#allocation5 + $0x48] ss:$28 sps:$4 sm:$0xff]  }
  0xb9   :  { %2506 = vmatprep.subr.bf16.mxu1 %v4401_v49  ;;  %v4474_v49 = vld [vmem:[#allocation5 + $0xa50] ss:$28 sps:$4 sm:$0xff]  }
  0xbb   :  { %2347 = vmatpush1.bf16.msra.mxu0 %v4402_v51  ;;  %v4483_v51 = vld [vmem:[#allocation5 + $0x80] ss:$28 sps:$4 sm:$0xff]  }
  0xbc   :  { %2507 = vmatpush1.bf16.msra.mxu1 %v4399_v50  ;;  %2348 = vmatprep.subr.bf16.mxu0 %v4410_v52  ;;  %v4485_v50 = vld [vmem:[#allocation5 + $0x84] ss:$28 sps:$4 sm:$0xff]  }
  0xbd   :  { %2508 = vmatprep.subr.bf16.mxu1 %v4407_v53  ;;  %v4486_v52 = vld [vmem:[#allocation5 + $0xa88] ss:$28 sps:$4 sm:$0xff]   ;;  %v4491_v53 = vld [vmem:[#allocation5 + $0xbc] ss:$28 sps:$4 sm:$0xff]  }
  0xbf   :  { %2349 = vmatpush1.bf16.msra.mxu0 %v4408_v55  ;;  %v4489_v55 = vld [vmem:[#allocation5 + $0xb8] ss:$28 sps:$4 sm:$0xff]  }
  0xc0   :  { %2509 = vmatpush1.bf16.msra.mxu1 %v4405_v54  ;;  %2350 = vmatprep.subr.bf16.mxu0 %v4416_v56  ;;  %v4510_v54 = vld [vmem:[#allocation5 + $0x1d8] ss:$28 sps:$4 sm:$0xff]  }
  0xc1   :  { %2510 = vmatprep.subr.bf16.mxu1 %v4413_v57  ;;  %v4494_v56 = vld [vmem:[#allocation5 + $0xf4] ss:$28 sps:$4 sm:$0xff]  }
  0xc2   :  { %v4492_v57 = vld [vmem:[#allocation5 + $0xf0] ss:$28 sps:$4 sm:$0xff]  }
  0xc3   :  { %2351 = vmatpush1.bf16.msra.mxu0 %v4414_v59  ;;  %v4495_v59 = vld [vmem:[#allocation5 + $0x128] ss:$28 sps:$4 sm:$0xff]  }
  0xc4   :  { %2511 = vmatpush1.bf16.msra.mxu1 %v4411_v58  ;;  %2352 = vmatprep.subr.bf16.mxu0 %v4422_v60  ;;  %v4497_v58 = vld [vmem:[#allocation5 + $0x12c] ss:$28 sps:$4 sm:$0xff]   ;;  %v4500_v60 = vld [vmem:[#allocation5 + $0x164] ss:$28 sps:$4 sm:$0xff]  }
  0xc5   :  { %2512 = vmatprep.subr.bf16.mxu1 %v4419_v61  ;;  %v4511_v61 = vld [vmem:[#allocation5 + $0x18] ss:$28 sps:$4 sm:$0xff]  }
  0xc7   :  { %2353 = vmatpush1.bf16.msra.mxu0 %v4420_v62  ;;  %v4515_v62 = vld [vmem:[#allocation5 + $0x210] ss:$28 sps:$4 sm:$0xff]  }
  0xc8   :  { %2513 = vmatpush1.bf16.msra.mxu1 %v4417_v1  ;;  %2354 = vmatprep.subr.bf16.mxu0 %v4428_v2  ;;  %v4498_v1 = vld [vmem:[#allocation5 + $0x160] ss:$28 sps:$4 sm:$0xff]  }
  0xc9   :  { %2514 = vmatprep.subr.bf16.mxu1 %v4425_v3  ;;  %v4503_v2 = vld [vmem:[#allocation5 + $0x19c] ss:$28 sps:$4 sm:$0xff]   ;;  %v4516_v3 = vld [vmem:[#allocation5 + $0x50] ss:$28 sps:$4 sm:$0xff]  }
  0xcb   :  { %2355 = vmatpush1.bf16.msra.mxu0 %v4426_v5  ;;  %v4501_v5 = vld [vmem:[#allocation5 + $0x198] ss:$28 sps:$4 sm:$0xff]  }
  0xcc   :  { %2515 = vmatpush1.bf16.msra.mxu1 %v4423_v4  ;;  %2356 = vmatprep.subr.bf16.mxu0 %v4434_v7  ;;  %v4520_v4 = vld [vmem:[#allocation5 + $0x248] ss:$28 sps:$4 sm:$0xff]   ;;  %v4506_v7 = vld [vmem:[#allocation5 + $0x1d4] ss:$28 sps:$4 sm:$0xff]  }
  0xcd   :  { %2516 = vmatprep.subr.bf16.mxu1 %v4431_v8  ;;  %v4521_v8 = vld [vmem:[#allocation5 + $0x88] ss:$28 sps:$4 sm:$0xff]  }
  0xcf   :  { %2357 = vmatpush1.bf16.msra.mxu0 %v4432_v10 }
  0xd0   :  { %2517 = vmatpush1.bf16.msra.mxu1 %v4429_v9  ;;  %2358 = vmatprep.subr.bf16.mxu0 %v4440_v13  ;;  %v4525_v9 = vld [vmem:[#allocation5 + $0x280] ss:$28 sps:$4 sm:$0xff]   ;;  %v4504_v13 = vld [vmem:[#allocation5 + $0x1d0] ss:$28 sps:$4 sm:$0xff]  }
  0xd1   :  { %2518 = vmatprep.subr.bf16.mxu1 %v4437_v15  ;;  %v4509_v15 = vld [vmem:[#allocation5 + $0x20c] ss:$28 sps:$4 sm:$0xff]  }
  0xd3   :  { %2359 = vmatpush1.bf16.msra.mxu0 %v4438_v17  ;;  %v4526_v17 = vld [vmem:[#allocation5 + $0xc0] ss:$28 sps:$4 sm:$0xff]  }
  0xd4   :  { %2519 = vmatpush1.bf16.msra.mxu1 %v4435_v16  ;;  %2360 = vmatprep.subr.bf16.mxu0 %v4446_v18  ;;  %v4530_v18 = vld [vmem:[#allocation5 + $0x2b8] ss:$28 sps:$4 sm:$0xff]  }
  0xd5   :  { %2520 = vmatprep.subr.bf16.mxu1 %v4443_v19 }
  0xd7   :  { %2361 = vmatpush1.bf16.msra.mxu0 %v4444_v22  ;;  %v4514_v22 = vld [vmem:[#allocation5 + $0x244] ss:$28 sps:$4 sm:$0xff]  }
  0xd8   :  { %2521 = vmatpush1.bf16.msra.mxu1 %v4441_v20  ;;  %2362 = vmatprep.subr.bf16.mxu0 %v4452_v24  ;;  %v4507_v20 = vld [vmem:[#allocation5 + $0x208] ss:$28 sps:$4 sm:$0xff]   ;;  %v4531_v24 = vld [vmem:[#allocation5 + $0xf8] ss:$28 sps:$4 sm:$0xff]  }
  0xd9   :  { %2522 = vmatprep.subr.bf16.mxu1 %v4449_v26  ;;  %v4535_v26 = vld [vmem:[#allocation5 + $0x2f0] ss:$28 sps:$4 sm:$0xff]  }
  0xdb   :  { %2363 = vmatpush1.bf16.msra.mxu0 %v4450_v27  ;;  %v4512_v27 = vld [vmem:[#allocation5 + $0x240] ss:$28 sps:$4 sm:$0xff]  }
  0xdc   :  { %2523 = vmatpush1.bf16.msra.mxu1 %v4447_v29  ;;  %2364 = vmatprep.subr.bf16.mxu0 %v4458_v30  ;;  %v4519_v29 = vld [vmem:[#allocation5 + $0x27c] ss:$28 sps:$4 sm:$0xff]   ;;  %v4536_v30 = vld [vmem:[#allocation5 + $0x130] ss:$28 sps:$4 sm:$0xff]  }
  0xdd   :  { %2524 = vmatprep.subr.bf16.mxu1 %v4455_v31  ;;  %v4540_v31 = vld [vmem:[#allocation5 + $0x328] ss:$28 sps:$4 sm:$0xff]  }
  0xdf   :  { %2365 = vmatpush1.bf16.msra.mxu0 %v4456_v33  ;;  %v4524_v33 = vld [vmem:[#allocation5 + $0x2b4] ss:$28 sps:$4 sm:$0xff]  }
  0xe0   :  { %2525 = vmatpush1.bf16.msra.mxu1 %v4453_v32  ;;  %2366 = vmatprep.subr.bf16.mxu0 %v4464_v34  ;;  %v4517_v32 = vld [vmem:[#allocation5 + $0x278] ss:$28 sps:$4 sm:$0xff]   ;;  %v4541_v34 = vld [vmem:[#allocation5 + $0x168] ss:$28 sps:$4 sm:$0xff]  }
  0xe1   :  { %2526 = vmatprep.subr.bf16.mxu1 %v4461_v12  ;;  %v4522_v12 = vld [vmem:[#allocation5 + $0x2b0] ss:$28 sps:$4 sm:$0xff]  }
  0xe3   :  { %2367 = vmatpush1.bf16.msra.mxu0 %v4462_v37  ;;  %v4529_v37 = vld [vmem:[#allocation5 + $0x2ec] ss:$28 sps:$4 sm:$0xff]  }
  0xe4   :  { %2527 = vmatpush1.bf16.msra.mxu1 %v4459_v36  ;;  %2368 = vmatprep.subr.bf16.mxu0 %v4470_v38  ;;  %v4545_v36 = vld [vmem:[#allocation5 + $0x360] ss:$28 sps:$4 sm:$0xff]  }
  0xe5   :  { %2528 = vmatprep.subr.bf16.mxu1 %v4467_v39  ;;  %v4546_v38 = vld [vmem:[#allocation5 + $0x1a0] ss:$28 sps:$4 sm:$0xff]   ;;  %v4550_v39 = vld [vmem:[#allocation5 + $0x558] ss:$28 sps:$4 sm:$0xff]  }
  0xe7   :  { %2369 = vmatpush1.bf16.msra.mxu0 %v4468_v11  ;;  %v4534_v11 = vld [vmem:[#allocation5 + $0x324] ss:$28 sps:$4 sm:$0xff]  }
  0xe8   :  { %2529 = vmatpush1.bf16.msra.mxu1 %v4465_v40  ;;  %2584 = vmatprep.subr.bf16.mxu0 %v4479_v41  ;;  %v4527_v40 = vld [vmem:[#allocation5 + $0x2e8] ss:$28 sps:$4 sm:$0xff]   ;;  %v4551_v41 = vld [vmem:[#allocation5 + $0x398] ss:$28 sps:$4 sm:$0xff]  }
  0xe9   :  { %2530 = vmatprep.subr.bf16.mxu1 %v4473_v42  ;;  %v4555_v42 = vld [vmem:[#allocation5 + $0x590] ss:$28 sps:$4 sm:$0xff]  }
  0xea   :  { %2371 = vmatmul.mubr.bf16.vlgmr.msra.gmra.mrb[0].mxu0 %v4943_v44 }
  0xeb   :  { %2585 = vmatpush1.bf16.msra.mxu0 %v4477_v45  ;;  %2616 = vmatprep.mubr.bf16.mxu0 %v4908_v63  ;;  %v4539_v45 = vld [vmem:[#allocation5 + $0x35c] ss:$28 sps:$4 sm:$0xff]  }
  0xec   :  { %2531 = vmatpush1.bf16.msra.mxu1 %v4471_v43  ;;  %2586 = vmatprep.subr.bf16.mxu0 %v4482_v46  ;;  %v4532_v43 = vld [vmem:[#allocation5 + $0x320] ss:$28 sps:$4 sm:$0xff]   ;;  %v4556_v46 = vld [vmem:[#allocation5 + $0x3d0] ss:$28 sps:$4 sm:$0xff]  }
  0xed   :  { %2532 = vmatprep.subr.bf16.mxu1 %v4476_v47  ;;  %v4560_v47 = vld [vmem:[#allocation5 + $0x5c8] ss:$28 sps:$4 sm:$0xff]  }
  0xef   :  { %2587 = vmatpush1.bf16.msra.mxu0 %v4480_v48  ;;  %v4537_v48 = vld [vmem:[#allocation5 + $0x358] ss:$28 sps:$4 sm:$0xff]  }
  0xf0   :  { %2533 = vmatpush1.bf16.msra.mxu1 %v4474_v49  ;;  %2588 = vmatprep.subr.bf16.mxu0 %v4485_v50  ;;  %v4544_v49 = vld [vmem:[#allocation5 + $0x394] ss:$28 sps:$4 sm:$0xff]   ;;  %v4561_v50 = vld [vmem:[#allocation5 + $0x408] ss:$28 sps:$4 sm:$0xff]  }
  0xf1   :  { %2543 = vmatprep.subr.bf16.mxu1 %v4488_v28  ;;  %v4565_v28 = vld [vmem:[#allocation5 + $0x600] ss:$28 sps:$4 sm:$0xff]  }
  0xf3   :  { %2535 = vmatmul.mubr.bf16.vlgmr.msra.gmra.mrb[4].mxu1 %v4943_v44  ;;  %2589 = vmatpush1.bf16.msra.mxu0 %v4483_v51  ;;  %v4542_v51 = vld [vmem:[#allocation5 + $0x390] ss:$28 sps:$4 sm:$0xff]  }
  0xf4   :  { %2590 = vmatprep.subr.bf16.mxu0 %v4491_v53  ;;  %2544 = vmatpush1.bf16.msra.mxu1 %v4486_v52  ;;  %v4549_v52 = vld [vmem:[#allocation5 + $0x3cc] ss:$28 sps:$4 sm:$0xff]   ;;  %v4566_v53 = vld [vmem:[#allocation5 + $0x440] ss:$28 sps:$4 sm:$0xff]  }
  0xf5   :  { %2575 = vmatprep.mubr.bf16.mxu1 %v4829_v0  ;;  %3991 = vmatprep.subr.bf16.mxu1 %v4510_v54  ;;  %v4570_v54 = vld [vmem:[#allocation5 + $0x638] ss:$28 sps:$4 sm:$0xff]  }
  0xf7   :  { %2591 = vmatpush1.bf16.msra.mxu0 %v4489_v55  ;;  %v4547_v55 = vld [vmem:[#allocation5 + $0x3c8] ss:$28 sps:$4 sm:$0xff]  }
  0xf8   :  { %2592 = vmatprep.subr.bf16.mxu0 %v4494_v56  ;;  %v4554_v56 = vld [vmem:[#allocation5 + $0x404] ss:$28 sps:$4 sm:$0xff]  }
  0xfb   :  { %2593 = vmatpush1.bf16.msra.mxu0 %v4492_v57  ;;  %v4571_v57 = vld [vmem:[#allocation5 + $0x478] ss:$28 sps:$4 sm:$0xff]  }
  0xfc   :  { %2594 = vmatprep.subr.bf16.mxu0 %v4497_v58  ;;  %v4575_v58 = vld [vmem:[#allocation5 + $0x670] ss:$28 sps:$4 sm:$0xff]  }
  0xff   :  { %3935 = vmatmul.mubr.msk.bf16.vlgmr.msra.gmra.mrb[4].mxu1 %vm2252_vm0, %v4903_v21  ;;  %2595 = vmatpush1.bf16.msra.mxu0 %v4495_v59  ;;  %v4552_v59 = vld [vmem:[#allocation5 + $0x400] ss:$28 sps:$4 sm:$0xff]  }
 0x100   :  { %2596 = vmatprep.subr.bf16.mxu0 %v4500_v60  ;;  %3992 = vmatpush3.bf16.msra.mxu1 %v4511_v61  ;;  %v4559_v60 = vld [vmem:[#allocation5 + $0x43c] ss:$28 sps:$4 sm:$0xff]   ;;  %v4576_v61 = vld [vmem:[#allocation5 + $0x4b0] ss:$28 sps:$4 sm:$0xff]  }
 0x101   :  { %3993 = vmatprep.subr.bf16.mxu1 %v4515_v62  ;;  %2780 = vmatprep.mubr.bf16.mxu1 %v4908_v63  ;;  %v4580_v62 = vld [vmem:[#allocation5 + $0x6a8] ss:$28 sps:$4 sm:$0xff]  }
 0x103   :  { %2597 = vmatpush1.bf16.msra.mxu0 %v4498_v1  ;;  %v4557_v1 = vld [vmem:[#allocation5 + $0x438] ss:$28 sps:$4 sm:$0xff]  }
 0x104   :  { %2598 = vmatprep.subr.bf16.mxu0 %v4503_v2  ;;  %3994 = vmatpush3.bf16.msra.mxu1 %v4516_v3  ;;  %v4581_v2 = vld [vmem:[#allocation5 + $0x4e8] ss:$28 sps:$4 sm:$0xff]   ;;  %v4585_v3 = vld [vmem:[#allocation5 + $0x6e0] ss:$28 sps:$4 sm:$0xff]  }
 0x105   :  { %3995 = vmatprep.subr.bf16.mxu1 %v4520_v4  ;;  %v4569_v4 = vld [vmem:[#allocation5 + $0x4ac] ss:$28 sps:$4 sm:$0xff]  }
 0x106   :  { %v4952_v10 = vpop.f32.mrb[0].mxu1 }
 0x107   :  { %2599 = vmatpush1.bf16.msra.mxu0 %v4501_v5  ;;  %v4954_v16 = vpop.f32.mrb[1].mxu1  ;;  %v4586_v5 = vld [vmem:[#allocation5 + $0x520] ss:$28 sps:$4 sm:$0xff]  }
 0x108   :  { %2600 = vmatprep.subr.bf16.mxu0 %v4506_v7  ;;  %3996 = vmatpush3.bf16.msra.mxu1 %v4521_v8  ;;  %v2417_v63 = vpop.f32.mrb[2].mxu1  ;;  %v4590_v7 = vld [vmem:[#allocation5 + $0x8d8] ss:$28 sps:$4 sm:$0xff]   ;;  %v4567_v8 = vld [vmem:[#allocation5 + $0x4a8] ss:$28 sps:$4 sm:$0xff]  }
 0x109   :  { %3997 = vmatprep.subr.bf16.mxu1 %v4525_v9  ;;  %v2418_v19 = vpop.f32.mrb[3].mxu1  ;;  %v4574_v9 = vld [vmem:[#allocation5 + $0x4e4] ss:$28 sps:$4 sm:$0xff]   ;;  %v4596_v63 = vld [vmem:[#allocation5 + $0x750] ss:$28 sps:$4 sm:$0xff]  }
 0x10a   :  { %v4600_v19 = vld [vmem:[#allocation5 + $0x948] ss:$28 sps:$4 sm:$0xff]  }
 0x10b   :  { %2601 = vmatpush1.bf16.msra.mxu0 %v4504_v13  ;;  %v4591_v13 = vld [vmem:[#allocation5 + $0x718] ss:$28 sps:$4 sm:$0xff]  }
 0x10c   :  { %2602 = vmatprep.subr.bf16.mxu0 %v4509_v15  ;;  %3998 = vmatpush3.bf16.msra.mxu1 %v4526_v17  ;;  %v4595_v15 = vld [vmem:[#allocation5 + $0x910] ss:$28 sps:$4 sm:$0xff]   ;;  %v4572_v17 = vld [vmem:[#allocation5 + $0x4e0] ss:$28 sps:$4 sm:$0xff]  }
 0x10d   :  { %3999 = vmatprep.subr.bf16.mxu1 %v4530_v18  ;;  %v4579_v18 = vld [vmem:[#allocation5 + $0x51c] ss:$28 sps:$4 sm:$0xff]  }
 0x10f   :  { %2603 = vmatpush1.bf16.msra.mxu0 %v4507_v20  ;;  %v4577_v20 = vld [vmem:[#allocation5 + $0x518] ss:$28 sps:$4 sm:$0xff]  }
 0x110   :  { %2604 = vmatprep.subr.bf16.mxu0 %v4514_v22  ;;  %4000 = vmatpush3.bf16.msra.mxu1 %v4531_v24  ;;  %v4584_v22 = vld [vmem:[#allocation5 + $0x554] ss:$28 sps:$4 sm:$0xff]   ;;  %v4601_v24 = vld [vmem:[#allocation5 + $0x788] ss:$28 sps:$4 sm:$0xff]  }
 0x111   :  { %4001 = vmatprep.subr.bf16.mxu1 %v4535_v26  ;;  %v4605_v26 = vld [vmem:[#allocation5 + $0x980] ss:$28 sps:$4 sm:$0xff]  }
 0x113   :  { %2605 = vmatpush1.bf16.msra.mxu0 %v4512_v27  ;;  %v4582_v27 = vld [vmem:[#allocation5 + $0x550] ss:$28 sps:$4 sm:$0xff]  }
 0x114   :  { %2606 = vmatprep.subr.bf16.mxu0 %v4519_v29  ;;  %4002 = vmatpush3.bf16.msra.mxu1 %v4536_v30  ;;  %v4589_v29 = vld [vmem:[#allocation5 + $0x58c] ss:$28 sps:$4 sm:$0xff]   ;;  %v4606_v30 = vld [vmem:[#allocation5 + $0x7c0] ss:$28 sps:$4 sm:$0xff]  }
 0x115   :  { %4003 = vmatprep.subr.bf16.mxu1 %v4540_v31  ;;  %v4610_v31 = vld [vmem:[#allocation5 + $0x9b8] ss:$28 sps:$4 sm:$0xff]  }
 0x117   :  { %2607 = vmatpush1.bf16.msra.mxu0 %v4517_v32  ;;  %v4587_v32 = vld [vmem:[#allocation5 + $0x588] ss:$28 sps:$4 sm:$0xff]  }
 0x118   :  { %2608 = vmatprep.subr.bf16.mxu0 %v4524_v33  ;;  %4004 = vmatpush3.bf16.msra.mxu1 %v4541_v34  ;;  %v4594_v33 = vld [vmem:[#allocation5 + $0x5c4] ss:$28 sps:$4 sm:$0xff]   ;;  %v4611_v34 = vld [vmem:[#allocation5 + $0x7f8] ss:$28 sps:$4 sm:$0xff]  }
 0x119   :  { %4005 = vmatprep.subr.bf16.mxu1 %v4545_v36  ;;  %v4592_v36 = vld [vmem:[#allocation5 + $0x5c0] ss:$28 sps:$4 sm:$0xff]  }
 0x11b   :  { %2609 = vmatpush1.bf16.msra.mxu0 %v4522_v12  ;;  %v4615_v12 = vld [vmem:[#allocation5 + $0x9f0] ss:$28 sps:$4 sm:$0xff]  }
 0x11c   :  { %2610 = vmatprep.subr.bf16.mxu0 %v4529_v37  ;;  %4006 = vmatpush3.bf16.msra.mxu1 %v4546_v38  ;;  %v4599_v37 = vld [vmem:[#allocation5 + $0x5fc] ss:$28 sps:$4 sm:$0xff]   ;;  %v4616_v38 = vld [vmem:[#allocation5 + $0x830] ss:$28 sps:$4 sm:$0xff]  }
 0x11d   :  { %4013 = vmatprep.subr.bf16.mxu1 %v4550_v39  ;;  %v4620_v39 = vld [vmem:[#allocation5 + $0xa28] ss:$28 sps:$4 sm:$0xff]  }
 0x11f   :  { %2611 = vmatpush1.bf16.msra.mxu0 %v4527_v40  ;;  %2781 = vmatmul.mubr.bf16.vlgmr.msra.gmra.mrb[8].mxu1 %v4917_v23  ;;  %v4597_v40 = vld [vmem:[#allocation5 + $0x5f8] ss:$28 sps:$4 sm:$0xff]  }
 0x120   :  { %2612 = vmatprep.subr.bf16.mxu0 %v4534_v11  ;;  %4014 = vmatpush3.bf16.msra.mxu1 %v4551_v41  ;;  %v4604_v11 = vld [vmem:[#allocation5 + $0x634] ss:$28 sps:$4 sm:$0xff]   ;;  %v4621_v41 = vld [vmem:[#allocation5 + $0x868] ss:$28 sps:$4 sm:$0xff]  }
 0x121   :  { %4015 = vmatprep.subr.bf16.mxu1 %v4555_v42  ;;  %2820 = vmatprep.mubr.bf16.mxu1 %v4919_v25  ;;  %v4625_v42 = vld [vmem:[#allocation5 + $0xa60] ss:$28 sps:$4 sm:$0xff]  }
 0x123   :  { %2613 = vmatpush1.bf16.msra.mxu0 %v4532_v43  ;;  %v4602_v43 = vld [vmem:[#allocation5 + $0x630] ss:$28 sps:$4 sm:$0xff]  }
 0x124   :  { %2614 = vmatprep.subr.bf16.mxu0 %v4539_v45  ;;  %4016 = vmatpush3.bf16.msra.mxu1 %v4556_v46  ;;  %v4609_v45 = vld [vmem:[#allocation5 + $0x66c] ss:$28 sps:$4 sm:$0xff]   ;;  %v4626_v46 = vld [vmem:[#allocation5 + $0x8a0] ss:$28 sps:$4 sm:$0xff]  }
 0x125   :  { %4017 = vmatprep.subr.bf16.mxu1 %v4560_v47  ;;  %v4607_v47 = vld [vmem:[#allocation5 + $0x668] ss:$28 sps:$4 sm:$0xff]  }
 0x127   :  { %2615 = vmatpush1.bf16.msra.mxu0 %v4537_v48  ;;  %v4614_v48 = vld [vmem:[#allocation5 + $0x6a4] ss:$28 sps:$4 sm:$0xff]  }
 0x128   :  { %2625 = vmatprep.subr.bf16.mxu0 %v4544_v49  ;;  %4018 = vmatpush3.bf16.msra.mxu1 %v4561_v50  ;;  %v4633_v49 = vld [vmem:[#allocation5 + $0xa98] ss:$28 sps:$4 sm:$0xff]   ;;  %v4831_v50 = vmov 0.0  }
 0x129   :  { %4019 = vmatprep.subr.bf16.mxu1 %v4565_v28  ;;  %v4670_v28 = vld [vmem:[%s5168_s2 + $0x40] sm:$0xff]  }
 0x12a   :  { %2617 = vmatmul.mubr.bf16.vlgmr.msra.gmra.mrb[4].mxu0 %v4917_v23  ;;  %v4564_v23 = vld [vmem:[#allocation5 + $0x474] ss:$28 sps:$4 sm:$0xff]  }
 0x12b   :  { %2626 = vmatpush1.bf16.msra.mxu0 %v4542_v51  ;;  %2657 = vmatprep.mubr.bf16.mxu0 %v4919_v25  ;;  %v4562_v25 = vld [vmem:[#allocation5 + $0x470] ss:$28 sps:$4 sm:$0xff]   ;;  %v4612_v51 = vld [vmem:[#allocation5 + $0x6a0] ss:$28 sps:$4 sm:$0xff]  }
 0x12c   :  { %2627 = vmatprep.subr.bf16.mxu0 %v4549_v52  ;;  %4020 = vmatpush3.bf16.msra.mxu1 %v4566_v53  ;;  %v4619_v52 = vld [vmem:[#allocation5 + $0x6dc] ss:$28 sps:$4 sm:$0xff]  }
 0x12d   :  { %4021 = vmatprep.subr.bf16.mxu1 %v4570_v54  ;;  %v4617_v53 = vld [vmem:[#allocation5 + $0x6d8] ss:$28 sps:$4 sm:$0xff]  }
 0x12e   :  { %v4624_v54 = vld [vmem:[#allocation5 + $0x714] ss:$28 sps:$4 sm:$0xff]  }
 0x12f   :  { %2628 = vmatpush1.bf16.msra.mxu0 %v4547_v55  ;;  %v4674_v55 = vld [vmem:[%s5168_s2] sm:$0xff]  }
 0x130   :  { %2629 = vmatprep.subr.bf16.mxu0 %v4554_v56  ;;  %4022 = vmatpush3.bf16.msra.mxu1 %v4571_v57  ;;  %v4675_v56 = vld [vmem:[%s5168_s2 + $0x48] sm:$0xff]   ;;  %v4622_v57 = vld [vmem:[#allocation5 + $0x710] ss:$28 sps:$4 sm:$0xff]  }
 0x131   :  { %4023 = vmatprep.subr.bf16.mxu1 %v4575_v58  ;;  %v4629_v58 = vld [vmem:[#allocation5 + $0x74c] ss:$28 sps:$4 sm:$0xff]  }
 0x133   :  { %2630 = vmatpush1.bf16.msra.mxu0 %v4552_v59  ;;  %v4679_v59 = vld [vmem:[%s5168_s2 + $0x8] sm:$0xff]  }
 0x134   :  { %2631 = vmatprep.subr.bf16.mxu0 %v4559_v60  ;;  %4024 = vmatpush3.bf16.msra.mxu1 %v4576_v61  ;;  %v4680_v60 = vld [vmem:[%s5168_s2 + $0x50] sm:$0xff]  }
 0x135   :  { %4025 = vmatprep.subr.bf16.mxu1 %v4580_v62  ;;  %v4627_v61 = vld [vmem:[#allocation5 + $0x748] ss:$28 sps:$4 sm:$0xff]  }
 0x136   :  { %v4632_v62 = vld [vmem:[#allocation5 + $0x784] ss:$28 sps:$4 sm:$0xff]  }
 0x137   :  { %2632 = vmatpush1.bf16.msra.mxu0 %v4557_v1  ;;  %v4681_v1 = vld [vmem:[%s5168_s2 + $0x10] sm:$0xff]  }
 0x138   :  { %2633 = vmatprep.subr.bf16.mxu0 %v4564_v23  ;;  %4026 = vmatpush3.bf16.msra.mxu1 %v4581_v2  ;;  %v4682_v23 = vld [vmem:[%s5168_s2 + $0x58] sm:$0xff]   ;;  %v4630_v2 = vld [vmem:[#allocation5 + $0x780] ss:$28 sps:$4 sm:$0xff]  }
 0x139   :  { %4027 = vmatprep.subr.bf16.mxu1 %v4585_v3  ;;  %v4684_v3 = vld [vmem:[%s5168_s2 + $0x60] sm:$0xff]  }
 0x13b   :  { %2634 = vmatpush1.bf16.msra.mxu0 %v4562_v25  ;;  %v4634_v25 = vld [vmem:[#allocation5 + $0x7b8] ss:$28 sps:$4 sm:$0xff]  }
 0x13c   :  { %2635 = vmatprep.subr.bf16.mxu0 %v4569_v4  ;;  %4028 = vmatpush3.bf16.msra.mxu1 %v4586_v5  ;;  %v4639_v4 = vld [vmem:[#allocation5 + $0x7f4] ss:$28 sps:$4 sm:$0xff]  }
 0x13d   :  { %4035 = vmatprep.subr.bf16.mxu1 %v4590_v7  ;;  %v4685_v5 = vld [vmem:[%s5168_s2 + $0x20] sm:$0xff]   ;;  %v4686_v7 = vld [vmem:[%s5168_s2 + $0x68] sm:$0xff]  }
 0x13f   :  { %2636 = vmatpush1.bf16.msra.mxu0 %v4567_v8  ;;  %2821 = vmatmul.mubr.bf16.vlgmr.msra.gmra.mrb[12].mxu1 %v4933_v35  ;;  %v4637_v8 = vld [vmem:[#allocation5 + $0x7f0] ss:$28 sps:$4 sm:$0xff]  }
 0x140   :  { %2637 = vmatprep.subr.bf16.mxu0 %v4574_v9  ;;  %4036 = vmatpush3.bf16.msra.mxu1 %v4591_v13  ;;  %v4642_v9 = vld [vmem:[#allocation5 + $0x82c] ss:$28 sps:$4 sm:$0xff]   ;;  %v4687_v13 = vld [vmem:[%s5168_s2 + $0x28] sm:$0xff]  }
 0x141   :  { %4037 = vmatprep.subr.bf16.mxu1 %v4595_v15  ;;  %2860 = vmatprep.mubr.bf16.mxu1 %v4935_v14  ;;  %v4688_v15 = vld [vmem:[%s5168_s2 + $0x70] sm:$0xff]  }
 0x143   :  { %2638 = vmatpush1.bf16.msra.mxu0 %v4572_v17  ;;  %v4640_v17 = vld [vmem:[#allocation5 + $0x828] ss:$28 sps:$4 sm:$0xff]  }
 0x144   :  { %2639 = vmatprep.subr.bf16.mxu0 %v4579_v18  ;;  %4038 = vmatpush3.bf16.msra.mxu1 %v4596_v63  ;;  %v4645_v18 = vld [vmem:[#allocation5 + $0x864] ss:$28 sps:$4 sm:$0xff]  }
 0x145   :  { %4039 = vmatprep.subr.bf16.mxu1 %v4600_v19  ;;  %v4689_v63 = vld [vmem:[%s5168_s2 + $0x30] sm:$0xff]   ;;  %v4690_v19 = vld [vmem:[%s5168_s2 + $0x78] sm:$0xff]  }
 0x147   :  { %2640 = vmatpush1.bf16.msra.mxu0 %v4577_v20  ;;  %v4643_v20 = vld [vmem:[#allocation5 + $0x860] ss:$28 sps:$4 sm:$0xff]  }
 0x148   :  { %2641 = vmatprep.subr.bf16.mxu0 %v4584_v22  ;;  %4040 = vmatpush3.bf16.msra.mxu1 %v4601_v24  ;;  %v4648_v22 = vld [vmem:[#allocation5 + $0x89c] ss:$28 sps:$4 sm:$0xff]   ;;  %v4691_v24 = vld [vmem:[%s5168_s2 + $0x38] sm:$0xff]  }
 0x149   :  { %4041 = vmatprep.subr.bf16.mxu1 %v4605_v26  ;;  %v4692_v26 = vld [vmem:[%s5168_s2 + $0xc0] sm:$0xff]  }
 0x14b   :  { %2642 = vmatpush1.bf16.msra.mxu0 %v4582_v27  ;;  %v4646_v27 = vld [vmem:[#allocation5 + $0x898] ss:$28 sps:$4 sm:$0xff]  }
 0x14c   :  { %2643 = vmatprep.subr.bf16.mxu0 %v4589_v29  ;;  %4042 = vmatpush3.bf16.msra.mxu1 %v4606_v30  ;;  %v4651_v29 = vld [vmem:[#allocation5 + $0x8d4] ss:$28 sps:$4 sm:$0xff]  }
 0x14d   :  { %4043 = vmatprep.subr.bf16.mxu1 %v4610_v31  ;;  %v4649_v30 = vld [vmem:[#allocation5 + $0x8d0] ss:$28 sps:$4 sm:$0xff]  }
 0x14e   :  { %v4654_v31 = vld [vmem:[#allocation5 + $0x90c] ss:$28 sps:$4 sm:$0xff]  }
 0x14f   :  { %2644 = vmatpush1.bf16.msra.mxu0 %v4587_v32  ;;  %v4652_v32 = vld [vmem:[#allocation5 + $0x908] ss:$28 sps:$4 sm:$0xff]  }
 0x150   :  { %2645 = vmatprep.subr.bf16.mxu0 %v4594_v33  ;;  %4044 = vmatpush3.bf16.msra.mxu1 %v4611_v34  ;;  %v4657_v33 = vld [vmem:[#allocation5 + $0x944] ss:$28 sps:$4 sm:$0xff]  }
 0x151   :  { %4045 = vmatprep.subr.bf16.mxu1 %v4615_v12  ;;  %v4655_v34 = vld [vmem:[#allocation5 + $0x940] ss:$28 sps:$4 sm:$0xff]  }
 0x152   :  { %v4660_v12 = vld [vmem:[#allocation5 + $0x97c] ss:$28 sps:$4 sm:$0xff]  }
 0x153   :  { %2646 = vmatpush1.bf16.msra.mxu0 %v4592_v36  ;;  %v4658_v36 = vld [vmem:[#allocation5 + $0x978] ss:$28 sps:$4 sm:$0xff]  }
 0x154   :  { %2647 = vmatprep.subr.bf16.mxu0 %v4599_v37  ;;  %4046 = vmatpush3.bf16.msra.mxu1 %v4616_v38  ;;  %v4663_v37 = vld [vmem:[#allocation5 + $0x9b4] ss:$28 sps:$4 sm:$0xff]  }
 0x155   :  { %4047 = vmatprep.subr.bf16.mxu1 %v4620_v39  ;;  %v4661_v38 = vld [vmem:[#allocation5 + $0x9b0] ss:$28 sps:$4 sm:$0xff]  }
 0x156   :  { %v4666_v39 = vld [vmem:[#allocation5 + $0x9ec] ss:$28 sps:$4 sm:$0xff]  }
 0x157   :  { %2648 = vmatpush1.bf16.msra.mxu0 %v4597_v40  ;;  %v4664_v40 = vld [vmem:[#allocation5 + $0x9e8] ss:$28 sps:$4 sm:$0xff]  }
 0x158   :  { %2649 = vmatprep.subr.bf16.mxu0 %v4604_v11  ;;  %4048 = vmatpush3.bf16.msra.mxu1 %v4621_v41  ;;  %v4669_v11 = vld [vmem:[#allocation5 + $0xa24] ss:$28 sps:$4 sm:$0xff]  }
 0x159   :  { %4049 = vmatprep.subr.bf16.mxu1 %v4625_v42  ;;  %v4667_v41 = vld [vmem:[#allocation5 + $0xa20] ss:$28 sps:$4 sm:$0xff]  }
 0x15a   :  { %v4673_v42 = vld [vmem:[#allocation5 + $0xa5c] ss:$28 sps:$4 sm:$0xff]  }
 0x15b   :  { %2650 = vmatpush1.bf16.msra.mxu0 %v4602_v43  ;;  %v4671_v43 = vld [vmem:[#allocation5 + $0xa58] ss:$28 sps:$4 sm:$0xff]  }
 0x15c   :  { %2651 = vmatprep.subr.bf16.mxu0 %v4609_v45  ;;  %4050 = vmatpush3.bf16.msra.mxu1 %v4626_v46  ;;  %v4678_v45 = vld [vmem:[#allocation5 + $0xa94] ss:$28 sps:$4 sm:$0xff]  }
 0x15d   :  { %4127 = vmatprep.subr.bf16.mxu1 %v4831_v50  ;;  %v4676_v46 = vld [vmem:[#allocation5 + $0xa90] ss:$28 sps:$4 sm:$0xff]  }
 0x15f   :  { %2652 = vmatpush1.bf16.msra.mxu0 %v4607_v47  ;;  %2861 = vmatmul.mubr.bf16.vlgmr.msra.gmra.mrb[16].mxu1 %v4943_v44  ;;  %v4833_v47 = vmov 1966171168  }
 0x160   :  { %2653 = vmatprep.subr.bf16.mxu0 %v4614_v48  ;;  %4128 = vmatpush3.bf16.msra.mxu1 %v4633_v49  ;;  %v2933_v48 = vunpack.c.l.s4 %v4833_v47  ;;  %v4724_v47 = vld [vmem:[%s5168_s2 + $0x138] sm:$0xff]  }
 0x161   :  { %4129 = vmatprep.mubr.msk.bf16.mxu1 %vm4832_vm1, %v4831_v50  ;;  %4059 = vmatprep.subr.bf16.mxu1 %v4670_v28 }
 0x162   :  { %v2934_v49 = vunpack.c.0.s8 %v2933_v48 }
 0x163   :  { %2654 = vmatpush1.bf16.msra.mxu0 %v4612_v51 }
 0x164   :  { %2655 = vmatprep.subr.bf16.mxu0 %v4619_v52 }
 0x167   :  { %2656 = vmatpush1.bf16.msra.mxu0 %v4617_v53  ;;  %4130 = vmatmul.mubr.msk.bf16.vlgmr.msra.gmra.mrb[20].mxu1 %vm2252_vm0, %v4903_v21 }
 0x168   :  { %2666 = vmatprep.subr.bf16.mxu0 %v4624_v54  ;;  %4060 = vmatpush3.bf16.msra.mxu1 %v4674_v55  ;;  %v5031_v55 = vsub.s32 %v2934_v49, %v4893_v6 }
 0x169   :  { %4061 = vmatprep.subr.bf16.mxu1 %v4675_v56 }
 0x16a   :  { %2658 = vmatmul.mubr.bf16.vlgmr.msra.gmra.mrb[4].mxu0 %v4933_v35  ;;  %v4636_v35 = vld [vmem:[#allocation5 + $0x7bc] ss:$28 sps:$4 sm:$0xff]  }
 0x16b   :  { %2667 = vmatpush1.bf16.msra.mxu0 %v4622_v57  ;;  %2698 = vmatprep.mubr.bf16.mxu0 %v4935_v14  ;;  %v4683_v14 = vld [vmem:[%s5168_s2 + $0x18] sm:$0xff]  }
 0x16c   :  { %2668 = vmatprep.subr.bf16.mxu0 %v4629_v58  ;;  %4062 = vmatpush3.bf16.msra.mxu1 %v4679_v59  ;;  %v4695_v59 = vld [vmem:[%s5168_s2 + $0x88] sm:$0xff]  }
 0x16d   :  { %4063 = vmatprep.subr.bf16.mxu1 %v4680_v60  ;;  %v4696_v60 = vld [vmem:[%s5168_s2 + $0xd0] sm:$0xff]  }
 0x16f   :  { %2669 = vmatpush1.bf16.msra.mxu0 %v4627_v61  ;;  %v4697_v61 = vld [vmem:[%s5168_s2 + $0x90] sm:$0xff]  }
 0x170   :  { %2670 = vmatprep.subr.bf16.mxu0 %v4632_v62  ;;  %4064 = vmatpush3.bf16.msra.mxu1 %v4681_v1  ;;  %v4698_v62 = vld [vmem:[%s5168_s2 + $0xd8] sm:$0xff]  }
 0x171   :  { %4065 = vmatprep.subr.bf16.mxu1 %v4682_v23  ;;  %v4699_v1 = vld [vmem:[%s5168_s2 + $0x98] sm:$0xff]   ;;  %v4700_v23 = vld [vmem:[%s5168_s2 + $0xe0] sm:$0xff]  }
 0x173   :  { %2671 = vmatpush1.bf16.msra.mxu0 %v4630_v2 }
 0x174   :  { %2672 = vmatprep.subr.bf16.mxu0 %v4636_v35  ;;  %4066 = vmatpush3.bf16.msra.mxu1 %v4683_v14 }
 0x175   :  { %4067 = vmatprep.subr.bf16.mxu1 %v4684_v3  ;;  %v4701_v3 = vld [vmem:[%s5168_s2 + $0xa0] sm:$0xff]  }
 0x177   :  { %2673 = vmatpush1.bf16.msra.mxu0 %v4634_v25 }
 0x178   :  { %2674 = vmatprep.subr.bf16.mxu0 %v4639_v4  ;;  %4068 = vmatpush3.bf16.msra.mxu1 %v4685_v5  ;;  %v4702_v5 = vld [vmem:[%s5168_s2 + $0xe8] sm:$0xff]  }
 0x179   :  { %4069 = vmatprep.subr.bf16.mxu1 %v4686_v7 }
 0x17b   :  { %2675 = vmatpush1.bf16.msra.mxu0 %v4637_v8 }
 0x17c   :  { %2676 = vmatprep.subr.bf16.mxu0 %v4642_v9  ;;  %4070 = vmatpush3.bf16.msra.mxu1 %v4687_v13  ;;  %v4703_v13 = vld [vmem:[%s5168_s2 + $0xa8] sm:$0xff]  }
 0x17d   :  { %4071 = vmatprep.subr.bf16.mxu1 %v4688_v15 }
 0x17f   :  { %2677 = vmatpush1.bf16.msra.mxu0 %v4640_v17  ;;  %v4704_v17 = vld [vmem:[%s5168_s2 + $0xf0] sm:$0xff]  }
 0x180   :  { %2678 = vmatprep.subr.bf16.mxu0 %v4645_v18  ;;  %4072 = vmatpush3.bf16.msra.mxu1 %v4689_v63  ;;  %v4705_v63 = vld [vmem:[%s5168_s2 + $0xb0] sm:$0xff]  }
 0x181   :  { %4073 = vmatprep.subr.bf16.mxu1 %v4690_v19  ;;  %v4706_v19 = vld [vmem:[%s5168_s2 + $0xf8] sm:$0xff]  }
 0x183   :  { %2679 = vmatpush1.bf16.msra.mxu0 %v4643_v20 }
 0x184   :  { %2680 = vmatprep.subr.bf16.mxu0 %v4648_v22  ;;  %4074 = vmatpush3.bf16.msra.mxu1 %v4691_v24  ;;  %v4707_v22 = vld [vmem:[%s5168_s2 + $0xb8] sm:$0xff]   ;;  %v4709_v24 = vld [vmem:[%s5168_s2 + $0x140] sm:$0xff]  }
 0x185   :  { %4081 = vmatprep.subr.bf16.mxu1 %v4692_v26  ;;  %v4710_v26 = vld [vmem:[%s5168_s2 + $0x100] sm:$0xff]  }
 0x187   :  { %2681 = vmatpush1.bf16.msra.mxu0 %v4646_v27 }
 0x188   :  { %2682 = vmatprep.subr.bf16.mxu0 %v4651_v29  ;;  %v4711_v29 = vld [vmem:[%s5168_s2 + $0x148] sm:$0xff]  }
 0x18b   :  { %2683 = vmatpush1.bf16.msra.mxu0 %v4649_v30  ;;  %v4712_v30 = vld [vmem:[%s5168_s2 + $0x108] sm:$0xff]  }
 0x18c   :  { %2684 = vmatprep.subr.bf16.mxu0 %v4654_v31  ;;  %v4713_v31 = vld [vmem:[%s5168_s2 + $0x150] sm:$0xff]  }
 0x18f   :  { %2685 = vmatpush1.bf16.msra.mxu0 %v4652_v32  ;;  %v4714_v32 = vld [vmem:[%s5168_s2 + $0x110] sm:$0xff]  }
 0x190   :  { %2686 = vmatprep.subr.bf16.mxu0 %v4657_v33  ;;  %v4715_v33 = vld [vmem:[%s5168_s2 + $0x158] sm:$0xff]  }
 0x193   :  { %2687 = vmatpush1.bf16.msra.mxu0 %v4655_v34  ;;  %v4716_v34 = vld [vmem:[%s5168_s2 + $0x118] sm:$0xff]  }
 0x194   :  { %2688 = vmatprep.subr.bf16.mxu0 %v4660_v12  ;;  %v4717_v12 = vld [vmem:[%s5168_s2 + $0x160] sm:$0xff]  }
 0x197   :  { %2689 = vmatpush1.bf16.msra.mxu0 %v4658_v36 }
 0x198   :  { %2690 = vmatprep.subr.bf16.mxu0 %v4663_v37 }
 0x19b   :  { %2691 = vmatpush1.bf16.msra.mxu0 %v4661_v38  ;;  %v4718_v38 = vld [vmem:[%s5168_s2 + $0x120] sm:$0xff]  }
 0x19c   :  { %2692 = vmatprep.subr.bf16.mxu0 %v4666_v39 }
 0x19f   :  { %2693 = vmatpush1.bf16.msra.mxu0 %v4664_v40 }
 0x1a0   :  { %2694 = vmatprep.subr.bf16.mxu0 %v4669_v11  ;;  %v4719_v11 = vld [vmem:[%s5168_s2 + $0x168] sm:$0xff]  }
 0x1a3   :  { %2695 = vmatpush1.bf16.msra.mxu0 %v4667_v41 }
 0x1a4   :  { %2696 = vmatprep.subr.bf16.mxu0 %v4673_v42  ;;  %v4720_v42 = vld [vmem:[%s5168_s2 + $0x128] sm:$0xff]  }
 0x1a7   :  { %2697 = vmatpush1.bf16.msra.mxu0 %v4671_v43  ;;  %v4721_v43 = vld [vmem:[%s5168_s2 + $0x170] sm:$0xff]  }
 0x1a8   :  { %2707 = vmatprep.subr.bf16.mxu0 %v4678_v45  ;;  %v4722_v45 = vld [vmem:[%s5168_s2 + $0x130] sm:$0xff]  }
 0x1aa   :  { %2699 = vmatmul.mubr.bf16.vlgmr.msra.gmra.mrb[4].mxu0 %v4943_v44 }
 0x1ab   :  { %2708 = vmatpush1.bf16.msra.mxu0 %v4676_v46  ;;  %2739 = vmatprep.mubr.bf16.mxu0 %v4829_v0  ;;  %v4723_v46 = vld [vmem:[%s5168_s2 + $0x178] sm:$0xff]  }
 0x1ac   :  { %4133 = vmatprep.subr.bf16.mxu0 %v4831_v50 }
 0x1b6   :  { %3936 = vmatmul.mubr.msk.bf16.vlgmr.msra.gmra.mrb[4].mxu0 %vm2252_vm0, %v4903_v21  ;;  %v4708_v21 = vld [vmem:[%s5168_s2 + $0x180] sm:$0xff]  }
 0x1b7   :  { %4135 = vmatprep.mubr.msk.bf16.mxu0 %vm4832_vm1, %v4831_v50  ;;  %4134 = vmatpush3.bf16.msra.mxu0 %v4708_v21 }
 0x1bd   :  { %v2372_v28 = vpop.f32.mrb[0].mxu0 }
 0x1be   :  { %v4139_v51 = vadd.f32 %v4952_v10, %v2372_v28  ;;  %v2374_v52 = vpop.f32.mrb[1].mxu0  ;;  %v4693_v10 = vld [vmem:[%s5168_s2 + $0x80] sm:$0xff]  }
 0x1bf   :  { %v4140_v44 = vadd.f32 %v4954_v16, %v2374_v52  ;;  %v2376_v53 = vpop.f32.mrb[2].mxu0  ;;  %v4694_v16 = vld [vmem:[%s5168_s2 + $0xc8] sm:$0xff]   ;;  %s4834_s2 = smov [#allocation8]  }
 0x1c0   :  { %v2908_v54 = vmax.f32 %v4139_v51, 0.0  ;;  %v2377_v0 = vpop.f32.mrb[3].mxu0  ;;  %s3577_s27 = sshll.u32 %s4834_s2, 4  ;;  %s3578_s27 = int_to_ptr.vmem [resolvable:$true] %s3577_s27 }
 0x1c1   :  { %v2909_v56 = vmax.f32 %v4140_v44, 0.0  ;;  %s4773_s28 = scalar_lea.vmem %s3578_s27, 112  ;;  %s4777_s29 = scalar_lea.vmem %s3578_s27, 128 }
 0x1c2   :  { %v2915_v58 = vpack.c.bf16 %v2908_v54, %v2908_v54  ;;  %p4774_p2 = scmp.ne.s32.totalorder %s3578_s27, %s4773_s28  ;;  %p4778_p3 = scmp.lt.s32.totalorder %s3578_s27, %s3578_s27 }
 0x1c3   :  { %v2916_v50 = vpack.c.bf16 %v2909_v56, %v2909_v56  ;;  %v3938_v57 = vpack.c.bf16 %v2909_v56, %v2908_v54  ;;  %p4779_p4 = scmp.lt.s32.totalorder %s4777_s29, %s4773_s28 }
 0x1c5   :  { %v2938_v6 = vrot.slane %v3938_v57, %v5031_v55  ;;  %3419 = vmatprep.mubr.bf16.mxu1 %v2916_v50  ;;  %p4780_p5 = por %p4779_p4, %p4778_p3 }
 0x1c6   :  { %3420 = vmatmul.mubr.bf16.vlgmr.msra.gmra.mrb[24].mxu1 %v2915_v58 }
 0x1c7   :  { %4082 = vmatpush3.bf16.msra.mxu1 %v4693_v10  ;;  %p4781_p6 = pnand %p4780_p5, %p4774_p2 }
 0x1c8   :  { %4083 = vmatprep.subr.bf16.mxu1 %v4694_v16 }
 0x1cb   :  { %4084 = vmatpush3.bf16.msra.mxu1 %v4695_v59 }
 0x1cc   :  { %4085 = vmatprep.subr.bf16.mxu1 %v4696_v60 }
 0x1cf   :  { %4086 = vmatpush3.bf16.msra.mxu1 %v4697_v61 }
 0x1d0   :  { %4087 = vmatprep.subr.bf16.mxu1 %v4698_v62 }
 0x1d2   :  { %v2577_v2 = vpop.f32.mrb[4].mxu1 }
 0x1d3   :  { %v2910_v35 = vmax.f32 %v2577_v2, 0.0  ;;  %v2579_v14 = vpop.f32.mrb[5].mxu1  ;;  %4088 = vmatpush3.bf16.msra.mxu1 %v4699_v1 }
 0x1d4   :  { %v2911_v25 = vmax.f32 %v2579_v14, 0.0  ;;  %v2581_v4 = vpop.f32.mrb[6].mxu1  ;;  %4089 = vmatprep.subr.bf16.mxu1 %v4700_v23 }
 0x1d5   :  { %v2582_v7 = vpop.f32.mrb[7].mxu1  ;;  %v2917_v27 = vpack.c.bf16 %v2910_v35, %v2910_v35 }
 0x1d6   :  { %v2918_v8 = vpack.c.bf16 %v2911_v25, %v2911_v25  ;;  %v3939_v9 = vpack.c.bf16 %v2911_v25, %v2910_v35 }
 0x1d7   :  { %4090 = vmatpush3.bf16.msra.mxu1 %v4701_v3 }
 0x1d8   :  { %v2945_v15 = vrot.slane %v3939_v9, %v5031_v55  ;;  %3459 = vmatprep.mubr.bf16.mxu1 %v2918_v8  ;;  %4091 = vmatprep.subr.bf16.mxu1 %v4702_v5 }
 0x1da   :  { %v2960_v18 = vcombine.low %v2938_v6, %v2945_v15 }
 0x1db   :  { %4092 = vmatpush3.bf16.msra.mxu1 %v4703_v13 }
 0x1dc   :  { %4093 = vmatprep.subr.bf16.mxu1 %v4704_v17  ;;  %v5081_v20 = vrot.slane %v2960_v18, %v5031_v55 }
 0x1df   :  { %4094 = vmatpush3.bf16.msra.mxu1 %v4705_v63 }
 0x1e0   :  { %4095 = vmatprep.subr.bf16.mxu1 %v4706_v19 }
 0x1e3   :  { %4096 = vmatpush3.bf16.msra.mxu1 %v4707_v22 }
 0x1e4   :  { %4103 = vmatprep.subr.bf16.mxu1 %v4709_v24 }
 0x1e6   :  { %3460 = vmatmul.mubr.bf16.vlgmr.msra.gmra.mrb[28].mxu1 %v2917_v27 }
 0x1e7   :  { %4104 = vmatpush3.bf16.msra.mxu1 %v4710_v26 }
 0x1e8   :  { %4105 = vmatprep.subr.bf16.mxu1 %v4711_v29 }
 0x1eb   :  { %4106 = vmatpush3.bf16.msra.mxu1 %v4712_v30 }
 0x1ec   :  { %4107 = vmatprep.subr.bf16.mxu1 %v4713_v31 }
 0x1ef   :  { %4108 = vmatpush3.bf16.msra.mxu1 %v4714_v32 }
 0x1f0   :  { %4109 = vmatprep.subr.bf16.mxu1 %v4715_v33 }
 0x1f2   :  { %v4007_v36 = vpop.f32.mrb[8].mxu1 }
 0x1f3   :  { %v4008_v37 = vpop.f32.mrb[9].mxu1  ;;  %4110 = vmatpush3.bf16.msra.mxu1 %v4716_v34 }
 0x1f4   :  { %v4009_v39 = vadd.f32 %v4008_v37, %v4007_v36  ;;  %v4010_v40 = vpop.f32.mrb[10].mxu1  ;;  %4111 = vmatprep.subr.bf16.mxu1 %v4717_v12 }
 0x1f5   :  { %v4011_v41 = vpop.f32.mrb[11].mxu1 }
 0x1f7   :  { %4112 = vmatpush3.bf16.msra.mxu1 %v4718_v38 }
 0x1f8   :  { %4113 = vmatprep.subr.bf16.mxu1 %v4719_v11 }
 0x1fb   :  { %4114 = vmatpush3.bf16.msra.mxu1 %v4720_v42 }
 0x1fc   :  { %4115 = vmatprep.subr.bf16.mxu1 %v4721_v43 }
 0x1ff   :  { %4116 = vmatpush3.bf16.msra.mxu1 %v4722_v45 }
 0x200   :  { %4117 = vmatprep.subr.bf16.mxu1 %v4723_v46 }
 0x203   :  { %4118 = vmatpush3.bf16.msra.mxu1 %v4724_v47 }
 0x212   :  { %v4029_v48 = vpop.f32.mrb[12].mxu1 }
 0x213   :  { %v4030_v49 = vpop.f32.mrb[13].mxu1 }
 0x214   :  { %v4031_v28 = vadd.f32 %v4030_v49, %v4029_v48  ;;  %v4032_v51 = vpop.f32.mrb[14].mxu1 }
 0x215   :  { %v4033_v52 = vpop.f32.mrb[15].mxu1 }
 0x216   :  { %v2823_v44 = vadd.f32 %v4031_v28, %v4009_v39 }
 0x232   :  { %v4051_v53 = vpop.f32.mrb[16].mxu1 }
 0x233   :  { %v4052_v54 = vpop.f32.mrb[17].mxu1 }
 0x234   :  { %v4053_v0 = vadd.f32 %v4052_v54, %v4051_v53  ;;  %v4054_v56 = vpop.f32.mrb[18].mxu1 }
 0x235   :  { %v4055_v21 = vpop.f32.mrb[19].mxu1 }
 0x236   :  { %v2863_v50 = vadd.f32 %v4053_v0, %v2823_v44 }
 0x23a   :  { %v2902_v57 = vpop.f32.mrb[20].mxu1 }
 0x23b   :  { %v2903_v10 = vadd.f32 %v2902_v57, %v2863_v50  ;;  %v4131_v58 = vpop.f32.mrb[21].mxu1 }
 0x23c   :  { %v2905_v16 = vpop.f32.mrb[22].mxu1 }
 0x23d   :  { %v2914_v6 = vmax.f32 %v2903_v10, 0.0  ;;  %v4132_v59 = vpop.f32.mrb[23].mxu1 }
 0x23f   :  { %v2921_v60 = vpack.c.bf16 %v2914_v6, %v2914_v6 }
 0x241   :  { %v2959_v61 = vrot.slane %v2921_v60, %v5031_v55  ;;  %4136 = vmatmul.mubr.msk.bf16.vlgmr.msra.gmra.mrb[8].mxu0 %vm2252_vm0, %v2921_v60 }
 0x289   :  { %v2741_v62 = vpop.f32.mrb[4].mxu0 }
 0x28a   :  { %v2912_v1 = vmax.f32 %v2741_v62, 0.0  ;;  %v2743_v23 = vpop.f32.mrb[5].mxu0 }
 0x28b   :  { %v2913_v2 = vmax.f32 %v2743_v23, 0.0  ;;  %v2745_v35 = vpop.f32.mrb[6].mxu0 }
 0x28c   :  { %v2746_v14 = vpop.f32.mrb[7].mxu0  ;;  %v2919_v4 = vpack.c.bf16 %v2912_v1, %v2912_v1 }
 0x28d   :  { %v2920_v3 = vpack.c.bf16 %v2913_v2, %v2913_v2  ;;  %v3940_v25 = vpack.c.bf16 %v2913_v2, %v2912_v1 }
 0x28f   :  { %v2952_v5 = vrot.slane %v3940_v25, %v5031_v55  ;;  %3499 = vmatprep.mubr.bf16.mxu1 %v2920_v3 }
 0x290   :  { %3500 = vmatmul.mubr.bf16.vlgmr.msra.gmra.mrb[32].mxu1 %v2919_v4 }
 0x291   :  { %v2961_v7 = vcombine.low %v2952_v5, %v2959_v61 }
 0x293   :  { %v2975_v8 = vrot.slane %v2961_v7, %v5031_v55 }
 0x295   :  { %v2976_v9 = vcombine.low %v5081_v20, %v2975_v8 }
 0x297   :  { %2991 = vst.msk [vmem:[#allocation8] sm:$0x7f] %vm2990_vm14, %v2976_v9 }
 0x299   :  { %v4075_v13 = vpop.f32.mrb[24].mxu1 }
 0x29a   :  { %v4076_v15 = vpop.f32.mrb[25].mxu1 }
 0x29b   :  { %v4077_v17 = vadd.f32 %v4076_v15, %v4075_v13  ;;  %v4078_v18 = vpop.f32.mrb[26].mxu1 }
 0x29c   :  { %v4079_v63 = vpop.f32.mrb[27].mxu1 }
 0x2b9   :  { %v4097_v19 = vpop.f32.mrb[28].mxu1 }
 0x2ba   :  { %v4098_v22 = vpop.f32.mrb[29].mxu1 }
 0x2bb   :  { %v4099_v24 = vadd.f32 %v4098_v22, %v4097_v19  ;;  %v4100_v26 = vpop.f32.mrb[30].mxu1 }
 0x2bc   :  { %v4101_v27 = vpop.f32.mrb[31].mxu1 }
 0x2bd   :  { %v3462_v29 = vadd.f32 %v4099_v24, %v4077_v17 }
 0x314   :  { %v3541_v30 = vpop.f32.mrb[8].mxu0 }
 0x315   :  { %v4137_v31 = vpop.f32.mrb[9].mxu0 }
 0x316   :  { %v3544_v32 = vpop.f32.mrb[10].mxu0 }
 0x317   :  { %v4138_v33 = vpop.f32.mrb[11].mxu0 }
 0x363   :  { %v4119_v55 = vpop.f32.mrb[32].mxu1 }
 0x364   :  { %v4120_v34 = vpop.f32.mrb[33].mxu1 }
 0x365   :  { %v4121_v12 = vadd.f32 %v4120_v34, %v4119_v55  ;;  %v4122_v20 = vpop.f32.mrb[34].mxu1 }
 0x366   :  { %v4123_v36 = vpop.f32.mrb[35].mxu1 }
 0x367   :  { %v3502_v37 = vadd.f32 %v4121_v12, %v3462_v29 }
 0x369   :  { %v3542_v38 = vadd.f32 %v3541_v30, %v3502_v37 }
 0x36b   :  { %v3548_v39 = vsel %vm3547_vm15, %v3542_v38, -inf }
 0x36c   :  { %3549 = vmax.xlane.f32.xlu0 %v3548_v39 }
 0x3f9   :  { %v3550_v40 = vpop.xlane.xlu0 %3549 }
 0x3fa   :  { %v3551_v11 = vsub.f32 %v3542_v38, %v3550_v40 }
 0x3fc   :  { %v3552_v41 = vmul.f32 1.442695, %v3551_v11 }
 0x3fe   :  { %4725 = vpow2.f32 %v3552_v41 }
 0x408   :  { %v4726_v42 = vpop.eup %4725 }
 0x409   :  { %v3554_v43 = vsel %vm3547_vm15, %v4726_v42, 0.0 }
 0x40a   :  { %3555 = vadd.xlane.f32.xlu0 %v3554_v43 }
 0x40b   :  { %4784 = shalt.err (!%p4781_p6)
}
 0x40c   :  { %s4785_s6 = scalar_lea.hbm %s5170_s4, 112 }
 0x40d   :  { %p4786_p7 = scmp.ne.s32.totalorder %s5170_s4, %s4785_s6  ;;  %p4789_p8 = scmp.lt.u32.totalorder %s4785_s6, %s5170_s4 }
 0x40f   :  { %p4791_p9 = pnand %p4789_p8, %p4786_p7 }
 0x411   :  { %4794 = shalt.err (!%p4791_p9)
}
 0x412   :  { %3580 = dma.vmem_to_hbm [thread:$0]  %s3578_s27, 112, %s5170_s4, [#allocation9]  }
 0x413   :  { %s4835_s12 = smov [#allocation7]  }
 0x414   :  { %s3567_s13 = sshll.u32 %s4835_s12, 4  ;;  %s3568_s13 = int_to_ptr.vmem [resolvable:$true] %s3567_s13 }
 0x415   :  { %s4795_s1 = scalar_lea.vmem %s3568_s13, 32  ;;  %p4800_p11 = scmp.lt.s32.totalorder %s3568_s13, %s3568_s13 }
 0x416   :  { %p4796_p10 = scmp.ne.s32.totalorder %s3568_s13, %s4795_s1  ;;  %p4801_p12 = scmp.lt.s32.totalorder %s4795_s1, %s4795_s1 }
 0x418   :  { %p4802_p13 = por %p4801_p12, %p4800_p11 }
 0x41a   :  { %p4803_p0 = pnand %p4802_p13, %p4796_p10 }
 0x497   :  { %v3556_v45 = vpop.xlane.xlu0 %3555 }
 0x498   :  { %4727 = vlog2.f32 %v3556_v45 }
 0x4a2   :  { %v4728_v46 = vpop.eup %4727 }
 0x4a3   :  { %v3558_v47 = vmul.f32 0.6931472, %v4728_v46 }
 0x4a5   :  { %v3559_v48 = vsub.f32 %v3551_v11, %v3558_v47 }
 0x4a7   :  { %3560 = vst.msk [vmem:[#allocation7] sm:$0x3] %vm3547_vm15, %v3559_v48 }
 0x4a8   :  { %4806 = shalt.err (!%p4803_p0)
}
 0x4a9   :  { %s4807_s4 = scalar_lea.hbm %s5169_s3, 32 }
 0x4aa   :  { %p4808_p1 = scmp.ne.s32.totalorder %s5169_s3, %s4807_s4  ;;  %p4811_p2 = scmp.lt.u32.totalorder %s4807_s4, %s5169_s3 }
 0x4ac   :  { %p4813_p3 = pnand %p4811_p2, %p4808_p1 }
 0x4ae   :  { %4816 = shalt.err (!%p4813_p3)
}
 0x4af   :  { %3570 = dma.vmem_to_hbm [thread:$0]  %s3568_s13, 32, %s5169_s3, [#allocation4]  }
 0x4b0   :  { %4821 = dma.done.wait [#allocation4], 32  }
 0x4b1   :  { %4822 = vsyncadd [#allocation4], 4294967264 }
 0x4b2   :  { %4823 = dma.done.wait [#allocation9], 112  }
 0x4b3   :  { %4824 = vsyncadd [#allocation9], 4294967184 }
 0x4b4   :  { %3587 = vsyncpa [#allocation3], 1 }
 0x4b5   :  { %3588 = vsyncpa [#allocation6], 1 }
 0x4b6   :  { %3589 = vsyncpa [#allocation4], 1 }
 0x4b7   :  { %3590 = vsyncpa [#allocation9], 1 }

</bundles_post_ra>
